<compile_context>
chip_gen: v7x
topology: tpu7x:2x2x1
jax: 0.10.0
libtpu: 0.0.40
codegen_flags: <defaults>
</compile_context>

<pallas_src>
import functools

import jax
import jax.numpy as jnp
import numpy as np
from jax.experimental import pallas as pl
from jax.experimental.pallas import tpu as pltpu


# Binary corner order c = a1*4 + a2*2 + a3 (a=0 -> low modes, a=1 -> high),
# mapped onto the PyTorch module's weights1..weights8 ordering.
_CORNER_PERM = (0, 3, 2, 6, 1, 5, 4, 7)


def _round_up(v, m):
    return ((v + m - 1) // m) * m


# ----------------------------------------------------------------------------
# Pallas kernel: complex channel contraction over lane blocks
#   out[b*Cout+o, :] = sum_i x[b*Cin+i, :] * w[i*Cout+o, :]   (complex, re/im)
# ----------------------------------------------------------------------------
def _compl_mul_kernel(x_ref, w_ref, o_ref, *, batch, cin, cout):
    """x_ref: (2, B*Cin, TM) f32; w_ref: (2, Cin*Cout, TM) bf16/f32 (streamed);
    o_ref: (2, B*Cout, TM) f32.  Plane 0 = real, plane 1 = imag."""
    acc_r = [None] * batch
    acc_i = [None] * batch
    # i-outer / b-inner: each (Cout, TM) weight slice is loaded + upcast exactly
    # once and only one f32 slice pair is live at a time (no full-block upcast).
    for i in range(cin):
        wr = w_ref[0, pl.ds(i * cout, cout), :].astype(jnp.float32)
        wi = w_ref[1, pl.ds(i * cout, cout), :].astype(jnp.float32)
        for b in range(batch):
            row = b * cin + i
            xr = x_ref[0, pl.ds(row, 1), :]      # (1, TM) ref-level load,
            xi = x_ref[1, pl.ds(row, 1), :]      # broadcast over cout sublanes
            pr = xr * wr - xi * wi
            pi = xr * wi + xi * wr
            acc_r[b] = pr if acc_r[b] is None else acc_r[b] + pr
            acc_i[b] = pi if acc_i[b] is None else acc_i[b] + pi
    # Direct per-batch stores (no concatenate epilogue).  Fully sublane-aligned
    # whenever cout % 8 == 0 (typical FNO channel counts).
    for b in range(batch):
        o_ref[0, pl.ds(b * cout, cout), :] = acc_r[b]
        o_ref[1, pl.ds(b * cout, cout), :] = acc_i[b]


# ----------------------------------------------------------------------------
# Per-chip VMEM policy and lane-tile chooser
# ----------------------------------------------------------------------------
def _vmem_policy():
    """(vmem_limit_bytes for CompilerParams, DMA-block budget for the chooser)."""
    try:
        cap = pltpu.get_tpu_info().vmem_capacity_bytes
    except Exception:
        cap = 64 * 1024 * 1024                      # conservative (v7x-sized)
    if cap <= 64 * 1024 * 1024:                     # v7x: 64 MiB/TC, 2 TCs
        return 48 * 1024 * 1024, 16 * 1024 * 1024
    return 64 * 1024 * 1024, 28 * 1024 * 1024       # v5e/v6e: 128 MiB physical


def _choose_block_m(l_total, batch, cin, cout, w_bytes, vmem_budget,
                    vreg_budget=128 * 1024, max_tm=1024):
    """Largest lane tile TM (multiple of 128, divides l_total, <= l_total//2 so
    the 'parallel' grid keeps >= 2 steps for v7x's two TensorCores) whose
    double-buffered DMA blocks fit `vmem_budget` and whose hot in-register
    working set (f32 accumulators for all batches + f32 weight slice + products)
    stays within ~half the 64 x 4 KiB register file."""
    dma_per_lane = 2 * (2 * batch * cin * 4          # x block (f32 re+im) x2 buf
                        + 2 * cin * cout * w_bytes   # w block
                        + 2 * batch * cout * 4)      # out block
    hot_per_lane = 4 * (2 * batch * cout             # accumulators (re+im)
                        + 4 * cout                   # f32 weight slice + products
                        + 4)                         # broadcast x rows
    best = 128
    tm = 128
    cap = min(max_tm, l_total // 2)
    while tm <= cap:
        if (l_total % tm == 0 and tm * dma_per_lane <= vmem_budget
                and tm * hot_per_lane <= vreg_budget):
            best = tm
        tm += 128
    return best


def _compl_mul(x_pack, w_pack, batch, cin, cout, l_total):
    """x_pack: (2, B*Cin, L) f32; w_pack: (2, Cin*Cout, L) bf16/f32
    -> (2, B*Cout, L) f32."""
    w_bytes = jnp.dtype(w_pack.dtype).itemsize
    vmem_limit, vmem_budget = _vmem_policy()
    tm = _choose_block_m(l_total, batch, cin, cout, w_bytes, vmem_budget)

    kernel = functools.partial(_compl_mul_kernel,
                               batch=batch, cin=cin, cout=cout)
    return pl.pallas_call(
        kernel,
        out_shape=jax.ShapeDtypeStruct((2, batch * cout, l_total), jnp.float32),
        grid=(l_total // tm,),
        in_specs=[pl.BlockSpec((2, batch * cin, tm), lambda m: (0, 0, m)),
                  pl.BlockSpec((2, cin * cout, tm), lambda m: (0, 0, m))],
        out_specs=pl.BlockSpec((2, batch * cout, tm), lambda m: (0, 0, m)),
        compiler_params=pltpu.CompilerParams(
            dimension_semantics=("parallel",),
            vmem_limit_bytes=vmem_limit),
    )(x_pack, w_pack)


# ----------------------------------------------------------------------------
# Weight packing (hoisted out of the jitted forward; weights are static)
# ----------------------------------------------------------------------------
def pack_weights(weights, modes, weight_dtype=jnp.bfloat16):
    """Pack the 8 complex64 weight tensors (Cin, Cout, m1, m2, m3, m4) into the
    kernel layout: (2, Cin*Cout, 8*Mpad) with plane 0/1 = real/imag, rows =
    i*Cout + o, lanes = corner*Mpad + flattened mode index.

    weight_dtype=bfloat16 halves weight HBM traffic (best on HBM-bound
    v5e/v6e); use float32 on v7x (VALU-bound) / for exact module parity."""
    m1, m2, m3, m4 = modes
    cin, cout = weights[0].shape[:2]
    m_total = m1 * m2 * m3 * m4
    m_pad = _round_up(m_total, 128)
    w = jnp.stack([weights[p] for p in _CORNER_PERM], axis=0)  # (8,Ci,Co,m1..m4)
    w = w.reshape(8, cin * cout, m_total)
    w = jnp.transpose(w, (1, 0, 2))                            # (Ci*Co, 8, M)
    w = jnp.pad(w, ((0, 0), (0, 0), (0, m_pad - m_total)))
    w = w.reshape(cin * cout, 8 * m_pad)
    return jnp.stack([jnp.real(w).astype(weight_dtype),
                      jnp.imag(w).astype(weight_dtype)], axis=0)


# ----------------------------------------------------------------------------
# SpectralConv4d forward
# ----------------------------------------------------------------------------
def spectral_conv4d(x, w_packed, modes):
    """x: (B, Cin, S1, S2, S3, S4) float32; w_packed: output of pack_weights."""
    B, Cin, S1, S2, S3, S4 = x.shape
    m1, m2, m3, m4 = modes
    S4r = S4 // 2 + 1
    M = m1 * m2 * m3 * m4
    m_pad = _round_up(M, 128)
    L = 8 * m_pad
    Cout = w_packed.shape[1] // Cin
    assert w_packed.shape == (2, Cin * Cout, L)

    # Scatter-free out_ft assembly requires non-overlapping lo/hi corners
    # (the PyTorch module with overlapping corners silently overwrites).
    assert 2 * m1 <= S1 and 2 * m2 <= S2 and 2 * m3 <= S3 and m4 <= S4r

    # TODO(synk): rfftn/irfftn have no Pallas TPU equivalent; done with XLA.
    x_ft = jnp.fft.rfftn(x, axes=(-4, -3, -2, -1))  # (B,Cin,S1,S2,S3,S4r) c64

    # --- gather the 8 corners (3 concats + 1 slice), fold corners into lanes -
    xg = jnp.concatenate([x_ft[:, :, :m1], x_ft[:, :, S1 - m1:]], axis=2)
    xg = jnp.concatenate([xg[:, :, :, :m2], xg[:, :, :, S2 - m2:]], axis=3)
    xg = jnp.concatenate([xg[:, :, :, :, :m3], xg[:, :, :, :, S3 - m3:]], axis=4)
    xg = xg[..., :m4]                                    # (B,Cin,2m1,2m2,2m3,m4)
    xg = xg.reshape(B, Cin, 2, m1, 2, m2, 2, m3, m4)
    xg = jnp.transpose(xg, (0, 1, 2, 4, 6, 3, 5, 7, 8))  # (B,Cin,2,2,2,m1..m4)
    xg = xg.reshape(B * Cin, 8, M)
    xg = jnp.pad(xg, ((0, 0), (0, 0), (0, m_pad - M)))   # lane-pad each corner
    xg = xg.reshape(B * Cin, L)                          # rows = b*Cin + i
    x_pack = jnp.stack([jnp.real(xg), jnp.imag(xg)], axis=0).astype(jnp.float32)

    out = _compl_mul(x_pack, w_packed, B, Cin, Cout, L)  # (2, B*Cout, L) f32

    # --- unfold corners back out of the lane axis -----------------------------
    out = out.reshape(2, B, Cout, 8, m_pad)[..., :M]
    out_c = (out[0] + 1j * out[1]).astype(jnp.complex64)
    out_c = out_c.reshape(B, Cout, 2, 2, 2, m1, m2, m3, m4)
    out_c = jnp.transpose(out_c, (0, 1, 2, 5, 3, 6, 4, 7, 8))
    # out_c: (B, Cout, 2, m1, 2, m2, 2, m3, m4)

    # --- scatter-free out_ft assembly: pad + 3 concats with zero middles ------
    out_c = jnp.pad(out_c, [(0, 0)] * 8 + [(0, S4r - m4)])
    z3 = jnp.zeros((B, Cout, 2, m1, 2, m2, S3 - 2 * m3, S4r), jnp.complex64)
    t = jnp.concatenate(
        [out_c[:, :, :, :, :, :, 0], z3, out_c[:, :, :, :, :, :, 1]], axis=6)
    z2 = jnp.zeros((B, Cout, 2, m1, S2 - 2 * m2, S3, S4r), jnp.complex64)
    t = jnp.concatenate([t[:, :, :, :, 0], z2, t[:, :, :, :, 1]], axis=4)
    z1 = jnp.zeros((B, Cout, S1 - 2 * m1, S2, S3, S4r), jnp.complex64)
    out_ft = jnp.concatenate([t[:, :, 0], z1, t[:, :, 1]], axis=2)

    return jnp.fft.irfftn(out_ft, s=(S1, S2, S3, S4), axes=(-4, -3, -2, -1))


# ----------------------------------------------------------------------------
# Deterministic parameter init (matches nn.Parameter shapes / scale)
# ----------------------------------------------------------------------------
def init_weights(key, in_c, out_c, m1, m2, m3, m4, n_weights=8):
    scale = 1.0 / (in_c * out_c)
    keys = jax.random.split(key, 2 * n_weights)
    ws = []
    for j in range(n_weights):
        wr = jax.random.uniform(keys[2 * j], (in_c, out_c, m1, m2, m3, m4),
                                dtype=jnp.float32)
        wi = jax.random.uniform(keys[2 * j + 1], (in_c, out_c, m1, m2, m3, m4),
                                dtype=jnp.float32)
        ws.append((scale * (wr + 1j * wi)).astype(jnp.complex64))
    return ws


# ----------------------------------------------------------------------------
# Pure-JAX reference (complex einsum path, mirrors the PyTorch module)
# ----------------------------------------------------------------------------
def ref_forward(x, weights, modes):
    B, Cin, S1, S2, S3, S4 = x.shape
    m1, m2, m3, m4 = modes
    Cout = weights[0].shape[1]
    x_ft = jnp.fft.rfftn(x, axes=(-4, -3, -2, -1))
    lo1, hi1 = slice(0, m1), slice(S1 - m1, S1)
    lo2, hi2 = slice(0, m2), slice(S2 - m2, S2)
    lo3, hi3 = slice(0, m3), slice(S3 - m3, S3)
    corners = [(lo1, lo2, lo3), (hi1, lo2, lo3), (lo1, hi2, lo3),
               (lo1, lo2, hi3), (hi1, hi2, lo3), (hi1, lo2, hi3),
               (lo1, hi2, hi3), (hi1, hi2, hi3)]
    out_ft = jnp.zeros((B, Cout, S1, S2, S3, S4 // 2 + 1), jnp.complex64)
    for (s1, s2, s3), w in zip(corners, weights):
        blk = jnp.einsum('bixyzt,ioxyzt->boxyzt',
                         x_ft[:, :, s1, s2, s3, :m4], w)
        out_ft = out_ft.at[:, :, s1, s2, s3, :m4].set(blk)
    return jnp.fft.irfftn(out_ft, s=(S1, S2, S3, S4), axes=(-4, -3, -2, -1))


def _round_weight_bf16(w):
    """Apply the same bf16 rounding the kernel's bf16 weight stream sees."""
    return (jnp.real(w).astype(jnp.bfloat16).astype(jnp.float32)
            + 1j * jnp.imag(w).astype(jnp.bfloat16).astype(jnp.float32)
            ).astype(jnp.complex64)


if __name__ == "__main__":
    B, Cin, Cout = 2, 4, 4
    S1 = S2 = S3 = S4 = 8
    modes = (4, 4, 4, 4)   # M = 256 -> Mpad = 256 -> L = 2048 lanes, TM = 512

    key = jax.random.PRNGKey(0)
    kx, kw = jax.random.split(key)
    x = jax.random.normal(kx, (B, Cin, S1, S2, S3, S4), dtype=jnp.float32)
    weights = init_weights(kw, Cin, Cout, *modes)

    # Weight packing hoisted out of the jitted forward (static across calls).
    w_bf16 = pack_weights(weights, modes, weight_dtype=jnp.bfloat16)  # v5e/v6e
    w_f32 = pack_weights(weights, modes, weight_dtype=jnp.float32)    # v7x

    fwd = jax.jit(lambda xx, ww: spectral_conv4d(xx, ww, modes))

    y_f32 = jax.block_until_ready(fwd(x, w_f32))
    y_bf16 = jax.block_until_ready(fwd(x, w_bf16))

    y_ref_full = jax.block_until_ready(ref_forward(x, weights, modes))

    # 1) f32 weight stream: tight check against full module semantics.
    np.testing.assert_allclose(np.asarray(y_f32), np.asarray(y_ref_full),
                               rtol=1e-3, atol=1e-4)

    # 2) bf16 weight stream: tight check vs. identically bf16-rounded weights,
    #    loose check vs. full precision (only the weight rounding differs).
    w_rounded = [_round_weight_bf16(w) for w in weights]
    y_ref_bf16 = jax.block_until_ready(ref_forward(x, w_rounded, modes))
    np.testing.assert_allclose(np.asarray(y_bf16), np.asarray(y_ref_bf16),
                               rtol=1e-3, atol=1e-4)
    rel_l2 = float(jnp.linalg.norm(y_bf16 - y_ref_full) /
                   jnp.linalg.norm(y_ref_full))
    assert rel_l2 < 1e-2, f"relative L2 error too large: {rel_l2}"

    print("KERNEL_OK")
</pallas_src>

<mosaic_0001>
module attributes {stable_mosaic.version = 11 : i64} {
  func.func @_compl_mul_kernel(%arg0: i32, %arg1: memref<2x8x512xf32, #tpu.memory_space<vmem>>, %arg2: memref<2x16x512xf32, #tpu.memory_space<vmem>>, %arg3: memref<2x8x512xf32, #tpu.memory_space<vmem>>) attributes {dimension_semantics = [#tpu.dimension_semantics<parallel>], iteration_bounds = array<i64: 4>, scalar_prefetch = 0 : i64, scratch_operands = 0 : i64, tpu.core_type = #tpu.core_type<tc>, window_params = [{transform_indices = @transform_0, window_bounds = array<i64: 2, 8, 512>}, {transform_indices = @transform_1, window_bounds = array<i64: 2, 16, 512>}, {transform_indices = @transform_2, window_bounds = array<i64: 2, 8, 512>}]} {
    %c0 = arith.constant 0 : index
    %c0_0 = arith.constant 0 : index
    %c0_1 = arith.constant 0 : index
    %0 = vector.load %arg2[%c0, %c0_0, %c0_1] : memref<2x16x512xf32, #tpu.memory_space<vmem>>, vector<1x4x512xf32>
    %1 = vector.shape_cast %0 : vector<1x4x512xf32> to vector<4x512xf32>
    %c1 = arith.constant 1 : index
    %c0_2 = arith.constant 0 : index
    %c0_3 = arith.constant 0 : index
    %2 = vector.load %arg2[%c1, %c0_2, %c0_3] : memref<2x16x512xf32, #tpu.memory_space<vmem>>, vector<1x4x512xf32>
    %3 = vector.shape_cast %2 : vector<1x4x512xf32> to vector<4x512xf32>
    %c0_4 = arith.constant 0 : index
    %c0_5 = arith.constant 0 : index
    %c0_6 = arith.constant 0 : index
    %4 = vector.load %arg1[%c0_4, %c0_5, %c0_6] : memref<2x8x512xf32, #tpu.memory_space<vmem>>, vector<1x1x512xf32>
    %5 = vector.shape_cast %4 : vector<1x1x512xf32> to vector<1x512xf32>
    %c1_7 = arith.constant 1 : index
    %c0_8 = arith.constant 0 : index
    %c0_9 = arith.constant 0 : index
    %6 = vector.load %arg1[%c1_7, %c0_8, %c0_9] : memref<2x8x512xf32, #tpu.memory_space<vmem>>, vector<1x1x512xf32>
    %7 = vector.shape_cast %6 : vector<1x1x512xf32> to vector<1x512xf32>
    %8 = vector.broadcast %5 : vector<1x512xf32> to vector<4x512xf32>
    %9 = arith.mulf %8, %1 : vector<4x512xf32>
    %10 = vector.broadcast %7 : vector<1x512xf32> to vector<4x512xf32>
    %11 = arith.mulf %10, %3 : vector<4x512xf32>
    %12 = arith.subf %9, %11 : vector<4x512xf32>
    %13 = vector.broadcast %5 : vector<1x512xf32> to vector<4x512xf32>
    %14 = arith.mulf %13, %3 : vector<4x512xf32>
    %15 = vector.broadcast %7 : vector<1x512xf32> to vector<4x512xf32>
    %16 = arith.mulf %15, %1 : vector<4x512xf32>
    %17 = arith.addf %14, %16 : vector<4x512xf32>
    %c0_10 = arith.constant 0 : index
    %c4 = arith.constant 4 : index
    %c0_11 = arith.constant 0 : index
    %18 = vector.load %arg1[%c0_10, %c4, %c0_11] : memref<2x8x512xf32, #tpu.memory_space<vmem>>, vector<1x1x512xf32>
    %19 = vector.shape_cast %18 : vector<1x1x512xf32> to vector<1x512xf32>
    %c1_12 = arith.constant 1 : index
    %c4_13 = arith.constant 4 : index
    %c0_14 = arith.constant 0 : index
    %20 = vector.load %arg1[%c1_12, %c4_13, %c0_14] : memref<2x8x512xf32, #tpu.memory_space<vmem>>, vector<1x1x512xf32>
    %21 = vector.shape_cast %20 : vector<1x1x512xf32> to vector<1x512xf32>
    %22 = vector.broadcast %19 : vector<1x512xf32> to vector<4x512xf32>
    %23 = arith.mulf %22, %1 : vector<4x512xf32>
    %24 = vector.broadcast %21 : vector<1x512xf32> to vector<4x512xf32>
    %25 = arith.mulf %24, %3 : vector<4x512xf32>
    %26 = arith.subf %23, %25 : vector<4x512xf32>
    %27 = vector.broadcast %19 : vector<1x512xf32> to vector<4x512xf32>
    %28 = arith.mulf %27, %3 : vector<4x512xf32>
    %29 = vector.broadcast %21 : vector<1x512xf32> to vector<4x512xf32>
    %30 = arith.mulf %29, %1 : vector<4x512xf32>
    %31 = arith.addf %28, %30 : vector<4x512xf32>
    %c0_15 = arith.constant 0 : index
    %c4_16 = arith.constant 4 : index
    %c0_17 = arith.constant 0 : index
    %32 = vector.load %arg2[%c0_15, %c4_16, %c0_17] : memref<2x16x512xf32, #tpu.memory_space<vmem>>, vector<1x4x512xf32>
    %33 = vector.shape_cast %32 : vector<1x4x512xf32> to vector<4x512xf32>
    %c1_18 = arith.constant 1 : index
    %c4_19 = arith.constant 4 : index
    %c0_20 = arith.constant 0 : index
    %34 = vector.load %arg2[%c1_18, %c4_19, %c0_20] : memref<2x16x512xf32, #tpu.memory_space<vmem>>, vector<1x4x512xf32>
    %35 = vector.shape_cast %34 : vector<1x4x512xf32> to vector<4x512xf32>
    %c0_21 = arith.constant 0 : index
    %c1_22 = arith.constant 1 : index
    %c0_23 = arith.constant 0 : index
    %36 = vector.load %arg1[%c0_21, %c1_22, %c0_23] : memref<2x8x512xf32, #tpu.memory_space<vmem>>, vector<1x1x512xf32>
    %37 = vector.shape_cast %36 : vector<1x1x512xf32> to vector<1x512xf32>
    %c1_24 = arith.constant 1 : index
    %c1_25 = arith.constant 1 : index
    %c0_26 = arith.constant 0 : index
    %38 = vector.load %arg1[%c1_24, %c1_25, %c0_26] : memref<2x8x512xf32, #tpu.memory_space<vmem>>, vector<1x1x512xf32>
    %39 = vector.shape_cast %38 : vector<1x1x512xf32> to vector<1x512xf32>
    %40 = vector.broadcast %37 : vector<1x512xf32> to vector<4x512xf32>
    %41 = arith.mulf %40, %33 : vector<4x512xf32>
    %42 = vector.broadcast %39 : vector<1x512xf32> to vector<4x512xf32>
    %43 = arith.mulf %42, %35 : vector<4x512xf32>
    %44 = arith.subf %41, %43 : vector<4x512xf32>
    %45 = vector.broadcast %37 : vector<1x512xf32> to vector<4x512xf32>
    %46 = arith.mulf %45, %35 : vector<4x512xf32>
    %47 = vector.broadcast %39 : vector<1x512xf32> to vector<4x512xf32>
    %48 = arith.mulf %47, %33 : vector<4x512xf32>
    %49 = arith.addf %46, %48 : vector<4x512xf32>
    %50 = arith.addf %12, %44 : vector<4x512xf32>
    %51 = arith.addf %17, %49 : vector<4x512xf32>
    %c0_27 = arith.constant 0 : index
    %c5 = arith.constant 5 : index
    %c0_28 = arith.constant 0 : index
    %52 = vector.load %arg1[%c0_27, %c5, %c0_28] : memref<2x8x512xf32, #tpu.memory_space<vmem>>, vector<1x1x512xf32>
    %53 = vector.shape_cast %52 : vector<1x1x512xf32> to vector<1x512xf32>
    %c1_29 = arith.constant 1 : index
    %c5_30 = arith.constant 5 : index
    %c0_31 = arith.constant 0 : index
    %54 = vector.load %arg1[%c1_29, %c5_30, %c0_31] : memref<2x8x512xf32, #tpu.memory_space<vmem>>, vector<1x1x512xf32>
    %55 = vector.shape_cast %54 : vector<1x1x512xf32> to vector<1x512xf32>
    %56 = vector.broadcast %53 : vector<1x512xf32> to vector<4x512xf32>
    %57 = arith.mulf %56, %33 : vector<4x512xf32>
    %58 = vector.broadcast %55 : vector<1x512xf32> to vector<4x512xf32>
    %59 = arith.mulf %58, %35 : vector<4x512xf32>
    %60 = arith.subf %57, %59 : vector<4x512xf32>
    %61 = vector.broadcast %53 : vector<1x512xf32> to vector<4x512xf32>
    %62 = arith.mulf %61, %35 : vector<4x512xf32>
    %63 = vector.broadcast %55 : vector<1x512xf32> to vector<4x512xf32>
    %64 = arith.mulf %63, %33 : vector<4x512xf32>
    %65 = arith.addf %62, %64 : vector<4x512xf32>
    %66 = arith.addf %26, %60 : vector<4x512xf32>
    %67 = arith.addf %31, %65 : vector<4x512xf32>
    %c0_32 = arith.constant 0 : index
    %c8 = arith.constant 8 : index
    %c0_33 = arith.constant 0 : index
    %68 = vector.load %arg2[%c0_32, %c8, %c0_33] : memref<2x16x512xf32, #tpu.memory_space<vmem>>, vector<1x4x512xf32>
    %69 = vector.shape_cast %68 : vector<1x4x512xf32> to vector<4x512xf32>
    %c1_34 = arith.constant 1 : index
    %c8_35 = arith.constant 8 : index
    %c0_36 = arith.constant 0 : index
    %70 = vector.load %arg2[%c1_34, %c8_35, %c0_36] : memref<2x16x512xf32, #tpu.memory_space<vmem>>, vector<1x4x512xf32>
    %71 = vector.shape_cast %70 : vector<1x4x512xf32> to vector<4x512xf32>
    %c0_37 = arith.constant 0 : index
    %c2 = arith.constant 2 : index
    %c0_38 = arith.constant 0 : index
    %72 = vector.load %arg1[%c0_37, %c2, %c0_38] : memref<2x8x512xf32, #tpu.memory_space<vmem>>, vector<1x1x512xf32>
    %73 = vector.shape_cast %72 : vector<1x1x512xf32> to vector<1x512xf32>
    %c1_39 = arith.constant 1 : index
    %c2_40 = arith.constant 2 : index
    %c0_41 = arith.constant 0 : index
    %74 = vector.load %arg1[%c1_39, %c2_40, %c0_41] : memref<2x8x512xf32, #tpu.memory_space<vmem>>, vector<1x1x512xf32>
    %75 = vector.shape_cast %74 : vector<1x1x512xf32> to vector<1x512xf32>
    %76 = vector.broadcast %73 : vector<1x512xf32> to vector<4x512xf32>
    %77 = arith.mulf %76, %69 : vector<4x512xf32>
    %78 = vector.broadcast %75 : vector<1x512xf32> to vector<4x512xf32>
    %79 = arith.mulf %78, %71 : vector<4x512xf32>
    %80 = arith.subf %77, %79 : vector<4x512xf32>
    %81 = vector.broadcast %73 : vector<1x512xf32> to vector<4x512xf32>
    %82 = arith.mulf %81, %71 : vector<4x512xf32>
    %83 = vector.broadcast %75 : vector<1x512xf32> to vector<4x512xf32>
    %84 = arith.mulf %83, %69 : vector<4x512xf32>
    %85 = arith.addf %82, %84 : vector<4x512xf32>
    %86 = arith.addf %50, %80 : vector<4x512xf32>
    %87 = arith.addf %51, %85 : vector<4x512xf32>
    %c0_42 = arith.constant 0 : index
    %c6 = arith.constant 6 : index
    %c0_43 = arith.constant 0 : index
    %88 = vector.load %arg1[%c0_42, %c6, %c0_43] : memref<2x8x512xf32, #tpu.memory_space<vmem>>, vector<1x1x512xf32>
    %89 = vector.shape_cast %88 : vector<1x1x512xf32> to vector<1x512xf32>
    %c1_44 = arith.constant 1 : index
    %c6_45 = arith.constant 6 : index
    %c0_46 = arith.constant 0 : index
    %90 = vector.load %arg1[%c1_44, %c6_45, %c0_46] : memref<2x8x512xf32, #tpu.memory_space<vmem>>, vector<1x1x512xf32>
    %91 = vector.shape_cast %90 : vector<1x1x512xf32> to vector<1x512xf32>
    %92 = vector.broadcast %89 : vector<1x512xf32> to vector<4x512xf32>
    %93 = arith.mulf %92, %69 : vector<4x512xf32>
    %94 = vector.broadcast %91 : vector<1x512xf32> to vector<4x512xf32>
    %95 = arith.mulf %94, %71 : vector<4x512xf32>
    %96 = arith.subf %93, %95 : vector<4x512xf32>
    %97 = vector.broadcast %89 : vector<1x512xf32> to vector<4x512xf32>
    %98 = arith.mulf %97, %71 : vector<4x512xf32>
    %99 = vector.broadcast %91 : vector<1x512xf32> to vector<4x512xf32>
    %100 = arith.mulf %99, %69 : vector<4x512xf32>
    %101 = arith.addf %98, %100 : vector<4x512xf32>
    %102 = arith.addf %66, %96 : vector<4x512xf32>
    %103 = arith.addf %67, %101 : vector<4x512xf32>
    %c0_47 = arith.constant 0 : index
    %c12 = arith.constant 12 : index
    %c0_48 = arith.constant 0 : index
    %104 = vector.load %arg2[%c0_47, %c12, %c0_48] : memref<2x16x512xf32, #tpu.memory_space<vmem>>, vector<1x4x512xf32>
    %105 = vector.shape_cast %104 : vector<1x4x512xf32> to vector<4x512xf32>
    %c1_49 = arith.constant 1 : index
    %c12_50 = arith.constant 12 : index
    %c0_51 = arith.constant 0 : index
    %106 = vector.load %arg2[%c1_49, %c12_50, %c0_51] : memref<2x16x512xf32, #tpu.memory_space<vmem>>, vector<1x4x512xf32>
    %107 = vector.shape_cast %106 : vector<1x4x512xf32> to vector<4x512xf32>
    %c0_52 = arith.constant 0 : index
    %c3 = arith.constant 3 : index
    %c0_53 = arith.constant 0 : index
    %108 = vector.load %arg1[%c0_52, %c3, %c0_53] : memref<2x8x512xf32, #tpu.memory_space<vmem>>, vector<1x1x512xf32>
    %109 = vector.shape_cast %108 : vector<1x1x512xf32> to vector<1x512xf32>
    %c1_54 = arith.constant 1 : index
    %c3_55 = arith.constant 3 : index
    %c0_56 = arith.constant 0 : index
    %110 = vector.load %arg1[%c1_54, %c3_55, %c0_56] : memref<2x8x512xf32, #tpu.memory_space<vmem>>, vector<1x1x512xf32>
    %111 = vector.shape_cast %110 : vector<1x1x512xf32> to vector<1x512xf32>
    %112 = vector.broadcast %109 : vector<1x512xf32> to vector<4x512xf32>
    %113 = arith.mulf %112, %105 : vector<4x512xf32>
    %114 = vector.broadcast %111 : vector<1x512xf32> to vector<4x512xf32>
    %115 = arith.mulf %114, %107 : vector<4x512xf32>
    %116 = arith.subf %113, %115 : vector<4x512xf32>
    %117 = vector.broadcast %109 : vector<1x512xf32> to vector<4x512xf32>
    %118 = arith.mulf %117, %107 : vector<4x512xf32>
    %119 = vector.broadcast %111 : vector<1x512xf32> to vector<4x512xf32>
    %120 = arith.mulf %119, %105 : vector<4x512xf32>
    %121 = arith.addf %118, %120 : vector<4x512xf32>
    %122 = arith.addf %86, %116 : vector<4x512xf32>
    %123 = arith.addf %87, %121 : vector<4x512xf32>
    %c0_57 = arith.constant 0 : index
    %c7 = arith.constant 7 : index
    %c0_58 = arith.constant 0 : index
    %124 = vector.load %arg1[%c0_57, %c7, %c0_58] : memref<2x8x512xf32, #tpu.memory_space<vmem>>, vector<1x1x512xf32>
    %125 = vector.shape_cast %124 : vector<1x1x512xf32> to vector<1x512xf32>
    %c1_59 = arith.constant 1 : index
    %c7_60 = arith.constant 7 : index
    %c0_61 = arith.constant 0 : index
    %126 = vector.load %arg1[%c1_59, %c7_60, %c0_61] : memref<2x8x512xf32, #tpu.memory_space<vmem>>, vector<1x1x512xf32>
    %127 = vector.shape_cast %126 : vector<1x1x512xf32> to vector<1x512xf32>
    %128 = vector.broadcast %125 : vector<1x512xf32> to vector<4x512xf32>
    %129 = arith.mulf %128, %105 : vector<4x512xf32>
    %130 = vector.broadcast %127 : vector<1x512xf32> to vector<4x512xf32>
    %131 = arith.mulf %130, %107 : vector<4x512xf32>
    %132 = arith.subf %129, %131 : vector<4x512xf32>
    %133 = vector.broadcast %125 : vector<1x512xf32> to vector<4x512xf32>
    %134 = arith.mulf %133, %107 : vector<4x512xf32>
    %135 = vector.broadcast %127 : vector<1x512xf32> to vector<4x512xf32>
    %136 = arith.mulf %135, %105 : vector<4x512xf32>
    %137 = arith.addf %134, %136 : vector<4x512xf32>
    %138 = arith.addf %102, %132 : vector<4x512xf32>
    %139 = arith.addf %103, %137 : vector<4x512xf32>
    %c0_62 = arith.constant 0 : index
    %c0_63 = arith.constant 0 : index
    %c0_64 = arith.constant 0 : index
    %140 = vector.load %arg3[%c0_62, %c0_63, %c0_64] : memref<2x8x512xf32, #tpu.memory_space<vmem>>, vector<1x4x512xf32>
    %141 = vector.shape_cast %140 : vector<1x4x512xf32> to vector<4x512xf32>
    %142 = vector.shape_cast %122 : vector<4x512xf32> to vector<1x4x512xf32>
    tpu.vector_store %arg3[%c0_62, %c0_63, %c0_64], %142 {strides = array<i32>} : memref<2x8x512xf32, #tpu.memory_space<vmem>>, vector<1x4x512xf32>,
    %c1_65 = arith.constant 1 : index
    %c0_66 = arith.constant 0 : index
    %c0_67 = arith.constant 0 : index
    %143 = vector.load %arg3[%c1_65, %c0_66, %c0_67] : memref<2x8x512xf32, #tpu.memory_space<vmem>>, vector<1x4x512xf32>
    %144 = vector.shape_cast %143 : vector<1x4x512xf32> to vector<4x512xf32>
    %145 = vector.shape_cast %123 : vector<4x512xf32> to vector<1x4x512xf32>
    tpu.vector_store %arg3[%c1_65, %c0_66, %c0_67], %145 {strides = array<i32>} : memref<2x8x512xf32, #tpu.memory_space<vmem>>, vector<1x4x512xf32>,
    %c0_68 = arith.constant 0 : index
    %c4_69 = arith.constant 4 : index
    %c0_70 = arith.constant 0 : index
    %146 = vector.load %arg3[%c0_68, %c4_69, %c0_70] : memref<2x8x512xf32, #tpu.memory_space<vmem>>, vector<1x4x512xf32>
    %147 = vector.shape_cast %146 : vector<1x4x512xf32> to vector<4x512xf32>
    %148 = vector.shape_cast %138 : vector<4x512xf32> to vector<1x4x512xf32>
    tpu.vector_store %arg3[%c0_68, %c4_69, %c0_70], %148 {strides = array<i32>} : memref<2x8x512xf32, #tpu.memory_space<vmem>>, vector<1x4x512xf32>,
    %c1_71 = arith.constant 1 : index
    %c4_72 = arith.constant 4 : index
    %c0_73 = arith.constant 0 : index
    %149 = vector.load %arg3[%c1_71, %c4_72, %c0_73] : memref<2x8x512xf32, #tpu.memory_space<vmem>>, vector<1x4x512xf32>
    %150 = vector.shape_cast %149 : vector<1x4x512xf32> to vector<4x512xf32>
    %151 = vector.shape_cast %139 : vector<4x512xf32> to vector<1x4x512xf32>
    tpu.vector_store %arg3[%c1_71, %c4_72, %c0_73], %151 {strides = array<i32>} : memref<2x8x512xf32, #tpu.memory_space<vmem>>, vector<1x4x512xf32>,
    return
  }
  func.func @transform_0(%arg0: i32) -> (i32, i32, i32) {
    %c0_i32 = arith.constant 0 : i32
    %c0_i32_0 = arith.constant 0 : i32
    %c0_i32_1 = arith.constant 0 : i32
    return %c0_i32, %c0_i32_0, %arg0 : i32, i32, i32
  }
  func.func @transform_1(%arg0: i32) -> (i32, i32, i32) {
    %c0_i32 = arith.constant 0 : i32
    %c0_i32_0 = arith.constant 0 : i32
    %c0_i32_1 = arith.constant 0 : i32
    return %c0_i32, %c0_i32_0, %arg0 : i32, i32, i32
  }
  func.func @transform_2(%arg0: i32) -> (i32, i32, i32) {
    %c0_i32 = arith.constant 0 : i32
    %c0_i32_0 = arith.constant 0 : i32
    %c0_i32_1 = arith.constant 0 : i32
    return %c0_i32, %c0_i32_0, %arg0 : i32, i32, i32
  }
}

</mosaic_0001>

<bundles_post_ra>
// kernel: _lambda_.1
= control target key start
LH: loop header
LB: loop body
LE: loop exit
PB: predicated region body
PF: predicated region fallthrough
CT: control target
= control target key end

     0   :  { %s1268_s9 = smov 0   ;;  %s1270_s10 = smov 0   ;;  %s2063_s0 = inlined_call_operand.vmem [shape: f32[2,8,2048], index: 0, kind: input, shape index: {}]   ;;  %s2064_s1 = inlined_call_operand.vmem [shape: f32[2,16,2048], index: 1, kind: input, shape index: {}]   ;;  %s2065_s2 = inlined_call_operand.vmem [shape: f32[2,8,2048], index: 2, kind: output, shape index: {}]  }
   0x1   :  { %s1272_s11 = smov 0  }
   0x2 LB: > { %s1144_s12 = sadd.s32 4294967295, %s1251_s11   ;;  %s1285_s13 = sadd.s32 1, %s1251_s11   ;;  %s1251_s11 = sphi %s1272_s11, %s2203_s11   ;;  %s1247_s10 = sphi %s1270_s10, %s2202_s10   ;;  %s1243_s9 = sphi %s1268_s9, %s2201_s9  }
   0x3   : > { %s16_s14 = ssub.s32 %s1251_s11, %s1285_s13  ;;  %s19_s15 = sadd.s32 1, %s1247_s10 }
   0x4   : > { %p17_p0 = scmp.eq.s32.totalorder %s16_s14, 0  ;;  %p26_p1 = scmp.ne.s32.totalorder %s1247_s10, %s1243_s9 }
   0x5   : > { %p27_p2 = scmp.eq.s32.totalorder %s1251_s11, 0  ;;  %p82_p3 = scmp.eq.s32.totalorder %s1144_s12, 3 }
   0x6   : > { %s1296_s16 = scalar_select %p17_p0, %s1247_s10, %s19_s15  }
   0x7   : > { %p1298_p4 = por %p27_p2, %p26_p1  ;;  %p1302_p5 = por %p82_p3, %p26_p1 }
   0x8   : > { %p1147_p6 = scmp.ge.s32.totalorder %s1251_s11, 4 }
   0xa   : > { %104 = sbr.rel (%p1147_p6) target bundleno = 37 (0x25), region = 16 }
  0x11   : > { %107 = sbr.rel (!%p1298_p4) target bundleno = 25 (0x19), region = 20  ;;  %s109_s19 = sand.u32 (%p1298_p4), 1, %s1247_s10  }
  0x12   : > { %s1202_s20 = sshll.u32 (%p1298_p4), %s1251_s11, 5  ;;  %s1148_s21 = sshll.u32 (%p1298_p4), %s109_s19, 6 }
  0x13   : > { %s114_s24 = scalar_lea.vmem (%p1298_p4), %s2063_s0, %s1202_s20  ;;  %s111_s25 = scalar_lea.vmem (%p1298_p4), [#allocation2], %s1148_s21 }
  0x14   : > { %v127_v0 = vld [vmem:[%s114_s24] sm:$0xff] (%p1298_p4)  ;;  %v129_v1 = vld [vmem:[%s114_s24 + $0x8] sm:$0xff] (%p1298_p4)  ;;  %v131_v2 = vld [vmem:[%s114_s24 + $0x10] sm:$0xff] (%p1298_p4) }
  0x15   : > { %128 = vst [vmem:[%s111_s25] sm:$0xff] (%p1298_p4), %v127_v0  ;;  %130 = vst [vmem:[%s111_s25 + $0x8] sm:$0xff] (%p1298_p4), %v129_v1  ;;  %v133_v3 = vld [vmem:[%s114_s24 + $0x18] sm:$0xff] (%p1298_p4)  ;;  %v135_v4 = vld [vmem:[%s114_s24 + $0x80] sm:$0xff] (%p1298_p4) }
  0x16   : > { %132 = vst [vmem:[%s111_s25 + $0x10] sm:$0xff] (%p1298_p4), %v131_v2  ;;  %v137_v5 = vld [vmem:[%s114_s24 + $0x88] sm:$0xff] (%p1298_p4)  ;;  %134 = vst [vmem:[%s111_s25 + $0x18] sm:$0xff] (%p1298_p4), %v133_v3  ;;  %v139_v6 = vld [vmem:[%s114_s24 + $0x90] sm:$0xff] (%p1298_p4) }
  0x17   : > { %136 = vst [vmem:[%s111_s25 + $0x20] sm:$0xff] (%p1298_p4), %v135_v4  ;;  %138 = vst [vmem:[%s111_s25 + $0x28] sm:$0xff] (%p1298_p4), %v137_v5  ;;  %v141_v7 = vld [vmem:[%s114_s24 + $0x98] sm:$0xff] (%p1298_p4) }
  0x18   : > { %140 = vst [vmem:[%s111_s25 + $0x30] sm:$0xff] %v139_v6  ;;  %142 = vst [vmem:[%s111_s25 + $0x38] sm:$0xff] %v141_v7 }
  0x19 PF: > { %148 = sbr.rel (!%p1298_p4) target bundleno = 37 (0x25), region = 43  ;;  %s150_s26 = sand.u32 (%p1298_p4), 1, %s1247_s10  }
  0x1a   : > { %s1203_s27 = sshll.u32 (%p1298_p4), %s1251_s11, 5  ;;  %s1151_s28 = sshll.u32 (%p1298_p4), %s150_s26, 7 }
  0x1b   : > { %s1321_s3 = scalar_lea.vmem (%p1298_p4), %s2064_s1, %s1203_s27  ;;  %s152_s4 = scalar_lea.vmem (%p1298_p4), [#allocation3], %s1151_s28 }
  0x1c   : > { %v168_v8 = vld [vmem:[%s1321_s3] sm:$0xff] (%p1298_p4)  ;;  %v170_v9 = vld [vmem:[%s1321_s3 + $0x8] sm:$0xff] (%p1298_p4)  ;;  %v172_v10 = vld [vmem:[%s1321_s3 + $0x10] sm:$0xff] (%p1298_p4) }
  0x1d   : > { %169 = vst [vmem:[%s152_s4] sm:$0xff] (%p1298_p4), %v168_v8  ;;  %171 = vst [vmem:[%s152_s4 + $0x8] sm:$0xff] (%p1298_p4), %v170_v9  ;;  %v174_v11 = vld [vmem:[%s1321_s3 + $0x18] sm:$0xff] (%p1298_p4)  ;;  %v176_v12 = vld [vmem:[%s1321_s3 + $0x80] sm:$0xff] (%p1298_p4) }
  0x1e   : > { %173 = vst [vmem:[%s152_s4 + $0x10] sm:$0xff] (%p1298_p4), %v172_v10  ;;  %v178_v13 = vld [vmem:[%s1321_s3 + $0x88] sm:$0xff] (%p1298_p4)  ;;  %175 = vst [vmem:[%s152_s4 + $0x18] sm:$0xff] (%p1298_p4), %v174_v11  ;;  %v180_v14 = vld [vmem:[%s1321_s3 + $0x90] sm:$0xff] (%p1298_p4) }
  0x1f   : > { %177 = vst [vmem:[%s152_s4 + $0x20] sm:$0xff] (%p1298_p4), %v176_v12  ;;  %179 = vst [vmem:[%s152_s4 + $0x28] sm:$0xff] (%p1298_p4), %v178_v13  ;;  %v182_v15 = vld [vmem:[%s1321_s3 + $0x98] sm:$0xff] (%p1298_p4)  ;;  %v184_v16 = vld [vmem:[%s1321_s3 + $0x100] sm:$0xff] (%p1298_p4) }
  0x20   : > { %181 = vst [vmem:[%s152_s4 + $0x30] sm:$0xff] %v180_v14  ;;  %183 = vst [vmem:[%s152_s4 + $0x38] sm:$0xff] %v182_v15  ;;  %v186_v17 = vld [vmem:[%s1321_s3 + $0x108] sm:$0xff]  ;;  %v188_v18 = vld [vmem:[%s1321_s3 + $0x110] sm:$0xff] }
  0x21   : > { %185 = vst [vmem:[%s152_s4 + $0x40] sm:$0xff] %v184_v16  ;;  %v190_v19 = vld [vmem:[%s1321_s3 + $0x118] sm:$0xff]  ;;  %187 = vst [vmem:[%s152_s4 + $0x48] sm:$0xff] %v186_v17  ;;  %v192_v20 = vld [vmem:[%s1321_s3 + $0x180] sm:$0xff] }
  0x22   : > { %189 = vst [vmem:[%s152_s4 + $0x50] sm:$0xff] %v188_v18  ;;  %191 = vst [vmem:[%s152_s4 + $0x58] sm:$0xff] %v190_v19  ;;  %v194_v21 = vld [vmem:[%s1321_s3 + $0x188] sm:$0xff]  ;;  %v196_v22 = vld [vmem:[%s1321_s3 + $0x190] sm:$0xff] }
  0x23   : > { %193 = vst [vmem:[%s152_s4 + $0x60] sm:$0xff] %v192_v20  ;;  %195 = vst [vmem:[%s152_s4 + $0x68] sm:$0xff] %v194_v21  ;;  %v198_v23 = vld [vmem:[%s1321_s3 + $0x198] sm:$0xff] }
  0x24   : > { %197 = vst [vmem:[%s152_s4 + $0x70] sm:$0xff] %v196_v22  ;;  %199 = vst [vmem:[%s152_s4 + $0x78] sm:$0xff] %v198_v23 }
  0x25 PF: > { %p1154_p7 = scmp.ge.s32.totalorder %s1251_s11, 1  ;;  %p204_p8 = scmp.lt.s32.totalorder %s1251_s11, 5 }
  0x27   : > { %p205_p9 = pnand %p1154_p7, %p204_p8 }
  0x29   : > { %208 = sbr.rel (%p205_p9) target bundleno = 161 (0xa1), region = 66 }
  0x30   : > { %s211_s5 = sand.u32 1, %s1243_s9   ;;  %v258_v24 = vlaneseq  ;;  %s1204_s15 = sshll.u32 (%p1302_p5), %s1144_s12, 5 }
  0x31   : > { %s1342_s6 = sshll.u32 %s211_s5, 6  ;;  %s1156_s7 = sshll.u32 %s211_s5, 7 }
  0x32   : > { %v1344_v25 = vshrl.u32 %v258_v24, 7  ;;  %s1347_s8 = scalar_lea.vmem [#allocation2], %s1342_s6  ;;  %s1361_s9 = scalar_lea.vmem [#allocation3], %s1156_s7 }
  0x33   : > { %v1350_v26 = vld [vmem:[%s1347_s8] ss:$8 sm:$0xf]  ;;  %v1367_v31 = vld [vmem:[%s1347_s8 + $0x1] ss:$8 sm:$0xf]  ;;  %s1031_s20 = scalar_lea.vmem (%p1302_p5), %s2065_s2, %s1204_s15 }
  0x34   : > { %v1353_v27 = vld [vmem:[%s1347_s8 + $0x20] ss:$8 sm:$0xf]  ;;  %v1356_v28 = vsub.s32 0, %v1344_v25  ;;  %v1359_v29 = vsub.s32 1, %v1344_v25  ;;  %s1568_s14 = scalar_lea.vmem [#allocation4], %s1342_s6 }
  0x35   : > { %v1364_v30 = vld [vmem:[%s1361_s9] sm:$0xf]  ;;  %v1384_v36 = vld [vmem:[%s1361_s9] sm:$0xf0]  ;;  %v1449_v56 = vld [vmem:[%s1361_s9 + $0x8] sm:$0xf] }
  0x36   : > { %2121 = vst [vmem:[#allocation5_spill] sm:$0xff] %v1356_v28  ;;  %2122 = vst [vmem:[#allocation6_spill] sm:$0xff] %v1359_v29  ;;  %v1370_v32 = vld [vmem:[%s1347_s8 + $0x21] ss:$8 sm:$0xf]  ;;  %v1377_v34 = vrot.slane %v1350_v26, %v1356_v28  ;;  %v1381_v35 = vrot.slane %v1353_v27, %v1356_v28  ;;  %v1391_v38 = vrot.slane %v1367_v31, %v1356_v28 }
  0x37   : > { %v1373_v33 = vld [vmem:[%s1361_s9 + $0x40] sm:$0xf]  ;;  %v1387_v37 = vld [vmem:[%s1361_s9 + $0x40] sm:$0xf0]  ;;  %v1395_v39 = vrot.slane %v1370_v32, %v1356_v28  ;;  %v1405_v42 = vrot.slane %v1350_v26, %v1359_v29  ;;  %v1409_v43 = vrot.slane %v1353_v27, %v1359_v29  ;;  %v1413_v44 = vrot.slane %v1367_v31, %v1359_v29  ;;  %v1466_v63 = vld [vmem:[%s1361_s9 + $0x48] sm:$0xf] }
  0x38   : > { %v1398_v40 = vld [vmem:[%s1347_s8 + $0x2] ss:$8 sm:$0xf]  ;;  %v1417_v45 = vrot.slane %v1370_v32, %v1359_v29  ;;  %v278_v46 = vmul.f32 %v1377_v34, %v1364_v30  ;;  %v303_v47 = vmul.f32 %v1373_v33, %v1381_v35  ;;  %v426_v48 = vmul.f32 %v1391_v38, %v1384_v36  ;;  %v1431_v51 = vld [vmem:[%s1347_s8 + $0x3] ss:$8 sm:$0xf] }
  0x39   : > { %v1401_v41 = vld [vmem:[%s1347_s8 + $0x22] ss:$8 sm:$0xf]  ;;  %v451_v49 = vmul.f32 %v1387_v37, %v1395_v39  ;;  %v1435_v52 = vrot.slane %v1398_v40, %v1356_v28  ;;  %v1442_v54 = vld [vmem:[%s1347_s8 + $0x23] ss:$8 sm:$0xf]  ;;  %v1446_v55 = vrot.slane %v1431_v51, %v1356_v28  ;;  %v1453_v57 = vrot.slane %v1398_v40, %v1359_v29 }
  0x3a   : > { %v1428_v50 = vld [vmem:[%s1361_s9 + $0x20] sm:$0xf]  ;;  %v1439_v53 = vrot.slane %v1401_v41, %v1356_v28  ;;  %v307_v58 = vsub.f32 %v278_v46, %v303_v47  ;;  %v1459_v61 = vld [vmem:[%s1361_s9 + $0x20] sm:$0xf0]  ;;  %v1463_v62 = vrot.slane %v1442_v54, %v1356_v28  ;;  %v279_v0 = vmul.f32 %v1405_v42, %v1449_v56  ;;  %v1482_v6 = vld [vmem:[%s1361_s9 + $0x8] sm:$0xf0] }
  0x3b   : > { %2123 = vst [vmem:[#allocation7_spill] sm:$0xff] %v1428_v50  ;;  %v455_v59 = vsub.f32 %v426_v48, %v451_v49  ;;  %v1456_v60 = vld [vmem:[%s1361_s9 + $0x60] sm:$0xf]  ;;  %v638_v1 = vmul.f32 %v1435_v52, %v1428_v50  ;;  %v1475_v3 = vld [vmem:[%s1361_s9 + $0x60] sm:$0xf0]  ;;  %v802_v4 = vmul.f32 %v1446_v55, %v1459_v61  ;;  %v304_v5 = vmul.f32 %v1466_v63, %v1409_v43 }
  0x3c   : > { %2124 = vst [vmem:[#allocation8_spill] sm:$0xff] %v1456_v60  ;;  %v663_v2 = vmul.f32 %v1456_v60, %v1439_v53  ;;  %2125 = vst [vmem:[#allocation9_spill] sm:$0xff] %v1482_v6  ;;  %v1485_v7 = vld [vmem:[%s1361_s9 + $0x48] sm:$0xf0]  ;;  %v827_v9 = vmul.f32 %v1475_v3, %v1463_v62  ;;  %v427_v10 = vmul.f32 %v1413_v44, %v1482_v6  ;;  %v1494_v12 = vld [vmem:[%s1361_s9 + $0x28] sm:$0xf] }
  0x3d   : > { %v475_v8 = vrot.slane %v455_v59, 4  ;;  %v452_v11 = vmul.f32 %v1485_v7, %v1417_v45  ;;  %2126 = vst [vmem:[#allocation10_spill] sm:$0xff] %v1494_v12  ;;  %v308_v14 = vsub.f32 %v279_v0, %v304_v5  ;;  %v639_v15 = vmul.f32 %v1453_v57, %v1494_v12  ;;  %v1503_v20 = vld [vmem:[%s1361_s9 + $0x68] sm:$0xf]  ;;  %v1512_v23 = vld [vmem:[%s1361_s9 + $0x28] sm:$0xf0] }
  0x3e   : > { %v667_v13 = vsub.f32 %v638_v1, %v663_v2  ;;  %v1500_v16 = vrot.slane %v1401_v41, %v1359_v29  ;;  %v831_v18 = vsub.f32 %v802_v4, %v827_v9  ;;  %v1507_v21 = vrot.slane %v1431_v51, %v1359_v29  ;;  %2127 = vst [vmem:[#allocation11_spill] sm:$0xff] %v1512_v23  ;;  %v1525_v59 = vld [vmem:[%s1361_s9 + $0x68] sm:$0xf0]  ;;  %v1540_v9 = vld [vmem:[%s1361_s9 + $0x10] sm:$0xf] }
  0x3f   : > { %v483_v17 = vadd.f32 %v475_v8, %v307_v58  ;;  %v456_v19 = vsub.f32 %v427_v10, %v452_v11  ;;  %v1516_v24 = vrot.slane %v1442_v54, %v1359_v29  ;;  %v1519_v46 = vsub.s32 2, %v1344_v25  ;;  %2130 = vst [vmem:[#allocation14_spill] sm:$0xff] %v1525_v59  ;;  %v1543_v10 = vld [vmem:[%s1361_s9 + $0x50] sm:$0xf] }
  0x40   : > { %v664_v22 = vmul.f32 %v1503_v20, %v1500_v16  ;;  %v1522_v47 = vsub.s32 3, %v1344_v25  ;;  %v851_v49 = vrot.slane %v831_v18, 4  ;;  %v803_v0 = vmul.f32 %v1507_v21, %v1512_v23  ;;  %v1558_v18 = vld [vmem:[%s1361_s9 + $0x10] sm:$0xf0] }
  0x41   : > { %2128 = vst [vmem:[#allocation12_spill] sm:$0xff] %v1519_v46  ;;  %v683_v48 = vadd.f32 %v667_v13, %v483_v17  ;;  %v476_v58 = vrot.slane %v456_v19, 4  ;;  %v828_v2 = vmul.f32 %v1525_v59, %v1516_v24  ;;  %v1533_v4 = vrot.slane %v1350_v26, %v1519_v46  ;;  %2133 = vst [vmem:[#allocation17_spill] sm:$0xff] %v1558_v18  ;;  %v1561_v19 = vld [vmem:[%s1361_s9 + $0x50] sm:$0xf0] }
  0x42   : > { %2129 = vst [vmem:[#allocation13_spill] sm:$0xff] %v1522_v47  ;;  %v668_v1 = vsub.f32 %v639_v15, %v664_v22  ;;  %v1537_v25 = vrot.slane %v1353_v27, %v1519_v46  ;;  %v1547_v11 = vrot.slane %v1367_v31, %v1519_v46  ;;  %v1551_v13 = vrot.slane %v1370_v32, %v1519_v46 }
  0x43   : > { %v859_v5 = vadd.f32 %v851_v49, %v683_v48  ;;  %v484_v8 = vadd.f32 %v476_v58, %v308_v14  ;;  %v832_v15 = vsub.f32 %v803_v0, %v828_v2  ;;  %v280_v17 = vmul.f32 %v1533_v4, %v1540_v9  ;;  %2134 = vst [vmem:[#allocation18_spill] sm:$0xff] %v1561_v19  ;;  %v1576_v0 = vld [vmem:[%s1361_s9 + $0x30] sm:$0xf] }
  0x44   : > { %2131 = vst [vmem:[#allocation15_spill] sm:$0xff] %v1537_v25  ;;  %2132 = vst [vmem:[#allocation16_spill] sm:$0xff] %v1551_v13  ;;  %v305_v14 = vmul.f32 %v1543_v10, %v1537_v25  ;;  %v1565_v22 = vrot.slane %v1398_v40, %v1519_v46  ;;  %v428_v49 = vmul.f32 %v1547_v11, %v1558_v18  ;;  %v1583_v25 = vld [vmem:[%s1361_s9 + $0x70] sm:$0xf]  ;;  %v1594_v18 = vld [vmem:[%s1361_s9 + $0x30] sm:$0xf0] }
  0x45   : > { %981 = vst [vmem:[%s1568_s14] sm:$0xf] %v859_v5  ;;  %v684_v48 = vadd.f32 %v668_v1, %v484_v8  ;;  %v453_v58 = vmul.f32 %v1561_v19, %v1551_v13  ;;  %2135 = vst [vmem:[#allocation19_spill] sm:$0xff] %v1576_v0  ;;  %v1580_v2 = vrot.slane %v1401_v41, %v1519_v46  ;;  %v852_v29 = vrot.slane %v832_v15, 4 }
  0x46   : > { %v309_v28 = vsub.f32 %v280_v17, %v305_v14  ;;  %2137 = vst [vmem:[#allocation21_spill] sm:$0xff] %v1583_v25  ;;  %v640_v1 = vmul.f32 %v1565_v22, %v1576_v0  ;;  %v1589_v5 = vrot.slane %v1431_v51, %v1519_v46  ;;  %2139 = vst [vmem:[#allocation23_spill] sm:$0xff] %v1594_v18  ;;  %v1605_v0 = vld [vmem:[%s1361_s9 + $0x70] sm:$0xf0] }
  0x47   : > { %2136 = vst [vmem:[#allocation20_spill] sm:$0xff] %v1580_v2  ;;  %v457_v8 = vsub.f32 %v428_v49, %v453_v58  ;;  %v665_v13 = vmul.f32 %v1583_v25, %v1580_v2  ;;  %v1598_v15 = vrot.slane %v1442_v54, %v1519_v46  ;;  %v1602_v17 = vrot.slane %v1350_v26, %v1522_v47  ;;  %v1610_v58 = vld [vmem:[%s1361_s9 + $0x18] sm:$0xf] }
  0x48   : > { %2138 = vst [vmem:[#allocation22_spill] sm:$0xff] %v1589_v5  ;;  %v860_v14 = vadd.f32 %v852_v29, %v684_v48  ;;  %v804_v49 = vmul.f32 %v1589_v5, %v1594_v18  ;;  %2141 = vst [vmem:[#allocation25_spill] sm:$0xff] %v1610_v58  ;;  %v1614_v2 = vrot.slane %v1353_v27, %v1522_v47  ;;  %v1623_v48 = vld [vmem:[%s1361_s9 + $0x58] sm:$0xf]  ;;  %v1628_v5 = vld [vmem:[%s1361_s9 + $0x18] sm:$0xf0] }
  0x49   : > { %2140 = vst [vmem:[#allocation24_spill] sm:$0xff] %v1602_v17  ;;  %v1618_v46 = vrot.slane %v1367_v31, %v1522_v47  ;;  %v477_v26 = vrot.slane %v457_v8, 4  ;;  %v669_v25 = vsub.f32 %v640_v1, %v665_v13  ;;  %v829_v29 = vmul.f32 %v1605_v0, %v1598_v15  ;;  %2144 = vst [vmem:[#allocation28_spill] sm:$0xff] %v1628_v5 }
  0x4a   : > { %2142 = vst [vmem:[#allocation26_spill] sm:$0xff] %v1614_v2  ;;  %v281_v18 = vmul.f32 %v1602_v17, %v1610_v58  ;;  %982 = vst [vmem:[%s1568_s14 + $0x8] sm:$0xf] %v860_v14  ;;  %v306_v27 = vmul.f32 %v1623_v48, %v1614_v2  ;;  %v1637_v13 = vrot.slane %v1370_v32, %v1522_v47  ;;  %v1644_v17 = vld [vmem:[%s1361_s9 + $0x58] sm:$0xf0] }
  0x4b   : > { %2143 = vst [vmem:[#allocation27_spill] sm:$0xff] %v1618_v46  ;;  %v429_v31 = vmul.f32 %v1618_v46, %v1628_v5  ;;  %v1641_v1 = vrot.slane %v1398_v40, %v1522_v47  ;;  %v485_v8 = vadd.f32 %v477_v26, %v309_v28  ;;  %v833_v58 = vsub.f32 %v804_v49, %v829_v29  ;;  %v1647_v14 = vld [vmem:[%s1361_s9 + $0x38] sm:$0xf]  ;;  %v1665_v49 = vld [vmem:[%s1361_s9 + $0x38] sm:$0xf0] }
  0x4c   : > { %2145 = vst [vmem:[#allocation29_spill] sm:$0xff] %v1637_v13  ;;  %2147 = vst [vmem:[#allocation31_spill] sm:$0xff] %v1647_v14  ;;  %v1651_v2 = vrot.slane %v1401_v41, %v1522_v47  ;;  %v1655_v5 = vrot.slane %v1431_v51, %v1522_v47  ;;  %v310_v32 = vsub.f32 %v281_v18, %v306_v27  ;;  %v1660_v46 = vld [vmem:[%s1361_s9 + $0x78] sm:$0xf]  ;;  %v1674_v18 = vld [vmem:[%s1361_s9 + $0x78] sm:$0xf0] }
  0x4d   : > { %2146 = vst [vmem:[#allocation30_spill] sm:$0xff] %v1641_v1  ;;  %v454_v40 = vmul.f32 %v1644_v17, %v1637_v13  ;;  %v641_v28 = vmul.f32 %v1641_v1, %v1647_v14  ;;  %2149 = vst [vmem:[#allocation33_spill] sm:$0xff] %v1665_v49  ;;  %v1669_v26 = vrot.slane %v1442_v54, %v1522_v47  ;;  %v853_v29 = vrot.slane %v833_v58, 4 }
  0x4e   : > { %2148 = vst [vmem:[#allocation32_spill] sm:$0xff] %v1651_v2  ;;  %v685_v41 = vadd.f32 %v669_v25, %v485_v8  ;;  %v666_v51 = vmul.f32 %v1660_v46, %v1651_v2  ;;  %v805_v27 = vmul.f32 %v1655_v5, %v1665_v49  ;;  %v311_v1 = vmul.f32 %v1373_v33, %v1377_v34 }
  0x4f   : > { %2150 = vst [vmem:[#allocation34_spill] sm:$0xff] %v1669_v26  ;;  %v458_v13 = vsub.f32 %v429_v31, %v454_v40  ;;  %v830_v14 = vmul.f32 %v1674_v18, %v1669_v26  ;;  %v315_v54 = vmul.f32 %v1381_v35, %v1364_v30  ;;  %v459_v8 = vmul.f32 %v1387_v37, %v1391_v38 }
  0x50   : > { %v861_v25 = vadd.f32 %v853_v29, %v685_v41  ;;  %v670_v58 = vsub.f32 %v641_v28, %v666_v51  ;;  %v463_v47 = vmul.f32 %v1395_v39, %v1384_v36  ;;  %v671_v40 = vmul.f32 %v1456_v60, %v1435_v52 }
  0x51   : > { %v478_v2 = vrot.slane %v458_v13, 4  ;;  %v834_v49 = vsub.f32 %v805_v27, %v830_v14  ;;  %v319_v31 = vadd.f32 %v315_v54, %v311_v1  ;;  %v675_v34 = vmul.f32 %v1439_v53, %v1428_v50 }
  0x52   : > { %983 = vst [vmem:[%s1568_s14 + $0x10] sm:$0xf] %v861_v25  ;;  %v467_v26 = vadd.f32 %v463_v47, %v459_v8  ;;  %v835_v35 = vmul.f32 %v1475_v3, %v1446_v55  ;;  %v839_v38 = vmul.f32 %v1463_v62, %v1459_v61  ;;  %v312_v39 = vmul.f32 %v1466_v63, %v1405_v42  ;;  %v2153_v8 = vld [vmem:[#allocation16_spill] sm:$0xff] }
  0x53   : > { %v486_v28 = vadd.f32 %v478_v2, %v310_v32  ;;  %v854_v41 = vrot.slane %v834_v49, 4  ;;  %v316_v13 = vmul.f32 %v1409_v43, %v1449_v56  ;;  %v679_v1 = vadd.f32 %v675_v34, %v671_v40 }
  0x54   : > { %v491_v52 = vrot.slane %v467_v26, 4  ;;  %v843_v47 = vadd.f32 %v839_v38, %v835_v35  ;;  %v460_v53 = vmul.f32 %v1485_v7, %v1413_v44  ;;  %v464_v62 = vmul.f32 %v1417_v45, %v1482_v6  ;;  %v2155_v35 = vld [vmem:[#allocation19_spill] sm:$0xff]  ;;  %v2156_v38 = vld [vmem:[#allocation20_spill] sm:$0xff] }
  0x55   : > { %v686_v14 = vadd.f32 %v670_v58, %v486_v28  ;;  %v320_v55 = vadd.f32 %v316_v13, %v312_v39  ;;  %v672_v2 = vmul.f32 %v1503_v20, %v1453_v57  ;;  %v676_v43 = vmul.f32 %v1500_v16, %v1494_v12  ;;  %v2151_v57 = vld [vmem:[#allocation15_spill] sm:$0xff]  ;;  %v2152_v58 = vld [vmem:[#allocation17_spill] sm:$0xff] }
  0x56   : > { %v499_v32 = vadd.f32 %v491_v52, %v319_v31  ;;  %v867_v42 = vrot.slane %v843_v47, 4  ;;  %v836_v49 = vmul.f32 %v1525_v59, %v1507_v21  ;;  %v468_v29 = vadd.f32 %v464_v62, %v460_v53  ;;  %v2160_v62 = vld [vmem:[#allocation25_spill] sm:$0xff] }
  0x57   : > { %v862_v26 = vadd.f32 %v854_v41, %v686_v14  ;;  %v840_v44 = vmul.f32 %v1516_v24, %v1512_v23  ;;  %v313_v51 = vmul.f32 %v1543_v10, %v1533_v4  ;;  %v680_v27 = vadd.f32 %v676_v43, %v672_v2  ;;  %v2154_v24 = vld [vmem:[#allocation21_spill] sm:$0xff]  ;;  %v2157_v41 = vld [vmem:[#allocation22_spill] sm:$0xff] }
  0x58   : > { %v687_v45 = vadd.f32 %v679_v1, %v499_v32  ;;  %v317_v54 = vmul.f32 %v2151_v57, %v1540_v9  ;;  %v461_v16 = vmul.f32 %v1561_v19, %v1547_v11  ;;  %v492_v25 = vrot.slane %v468_v29, 4  ;;  %v2158_v1 = vld [vmem:[#allocation23_spill] sm:$0xff]  ;;  %v2161_v2 = vld [vmem:[#allocation26_spill] sm:$0xff] }
  0x59   : > { %984 = vst [vmem:[%s1568_s14 + $0x18] sm:$0xf] %v862_v26  ;;  %v844_v21 = vadd.f32 %v840_v44, %v836_v49  ;;  %v465_v31 = vmul.f32 %v2153_v8, %v2152_v58  ;;  %v673_v40 = vmul.f32 %v2154_v24, %v1565_v22  ;;  %v677_v28 = vmul.f32 %v2156_v38, %v2155_v35  ;;  %v2159_v22 = vld [vmem:[#allocation24_spill] sm:$0xff]  ;;  %v2164_v44 = vld [vmem:[#allocation29_spill] sm:$0xff] }
  0x5a   : > { %v875_v4 = vadd.f32 %v867_v42, %v687_v45  ;;  %v321_v34 = vadd.f32 %v317_v54, %v313_v51  ;;  %v837_v39 = vmul.f32 %v1605_v0, %v2157_v41  ;;  %v500_v11 = vadd.f32 %v492_v25, %v320_v55  ;;  %v2162_v42 = vld [vmem:[#allocation27_spill] sm:$0xff]  ;;  %v2165_v54 = vld [vmem:[#allocation30_spill] sm:$0xff] }
  0x5b   : > { %v868_v13 = vrot.slane %v844_v21, 4  ;;  %v469_v52 = vadd.f32 %v465_v31, %v461_v16  ;;  %v841_v47 = vmul.f32 %v1598_v15, %v2158_v1  ;;  %v681_v53 = vadd.f32 %v677_v28, %v673_v40  ;;  %v1738_v49 = vld [vmem:[%s1347_s8 + $0x4] ss:$8 sm:$0xf] }
  0x5c   : > { %1189 = vst [vmem:[%s1568_s14 + $0x20] sm:$0xf] %v875_v4  ;;  %v314_v14 = vmul.f32 %v1623_v48, %v2159_v22  ;;  %v318_v32 = vmul.f32 %v2161_v2, %v2160_v62  ;;  %v462_v43 = vmul.f32 %v1644_v17, %v2162_v42  ;;  %v688_v55 = vadd.f32 %v680_v27, %v500_v11  ;;  %v2163_v15 = vld [vmem:[#allocation28_spill] sm:$0xff]  ;;  %v2166_v25 = vld [vmem:[#allocation31_spill] sm:$0xff] }
  0x5d   : > { %v493_v26 = vrot.slane %v469_v52, 4  ;;  %v845_v29 = vadd.f32 %v841_v47, %v837_v39  ;;  %v466_v51 = vmul.f32 %v2164_v44, %v2163_v15  ;;  %v1743_v45 = vld [vmem:[%s1347_s8 + $0x24] ss:$8 sm:$0xf]  ;;  %v674_v16 = vmul.f32 %v1660_v46, %v2165_v54 }
  0x5e   : > { %v322_v57 = vadd.f32 %v318_v32, %v314_v14  ;;  %v2167_v21 = vld [vmem:[#allocation32_spill] sm:$0xff]  ;;  %v838_v31 = vmul.f32 %v1674_v18, %v1655_v5  ;;  %v876_v4 = vadd.f32 %v868_v13, %v688_v55  ;;  %v2168_v52 = vld [vmem:[#allocation33_spill] sm:$0xff]  ;;  %v2169_v47 = vld [vmem:[#allocation34_spill] sm:$0xff] }
  0x5f   : > { %v678_v8 = vmul.f32 %v2167_v21, %v2166_v25  ;;  %v1752_v40 = vld [vmem:[%s1347_s8 + $0x5] ss:$8 sm:$0xf]  ;;  %v501_v38 = vadd.f32 %v493_v26, %v321_v34  ;;  %v869_v28 = vrot.slane %v845_v29, 4  ;;  %v470_v41 = vadd.f32 %v466_v51, %v462_v43 }
  0x60   : > { %v1755_v27 = vld [vmem:[%s1347_s8 + $0x25] ss:$8 sm:$0xf]  ;;  %v1758_v39 = vld [vmem:[%s1347_s8 + $0x6] ss:$8 sm:$0xf]  ;;  %v842_v22 = vmul.f32 %v2169_v47, %v2168_v52 }
  0x61   : > { %v682_v11 = vadd.f32 %v678_v8, %v674_v16  ;;  %v2170_v14 = vld [vmem:[#allocation5_spill] sm:$0xff]  ;;  %1190 = vst [vmem:[%s1568_s14 + $0x28] sm:$0xf] %v876_v4  ;;  %v689_v34 = vadd.f32 %v681_v53, %v501_v38  ;;  %v494_v13 = vrot.slane %v470_v41, 4 }
  0x62   : > { %v1764_v5 = vrot.slane %v1738_v49, %v2170_v14  ;;  %v1768_v2 = vrot.slane %v1743_v45, %v2170_v14  ;;  %v1773_v32 = vrot.slane %v1752_v40, %v2170_v14  ;;  %v1777_v42 = vrot.slane %v1755_v27, %v2170_v14  ;;  %v1780_v43 = vld [vmem:[%s1347_s8 + $0x26] ss:$8 sm:$0xf]  ;;  %v1791_v44 = vld [vmem:[%s1347_s8 + $0x7] ss:$8 sm:$0xf] }
  0x63   : > { %v846_v55 = vadd.f32 %v842_v22, %v838_v31  ;;  %v1788_v53 = vrot.slane %v1758_v39, %v2170_v14  ;;  %v1794_v51 = vld [vmem:[%s1347_s8 + $0x27] ss:$8 sm:$0xf]  ;;  %v877_v54 = vadd.f32 %v869_v28, %v689_v34  ;;  %v502_v16 = vadd.f32 %v494_v13, %v322_v57 }
  0x64   : > { %v348_v26 = vmul.f32 %v1764_v5, %v1364_v30  ;;  %v373_v29 = vmul.f32 %v1373_v33, %v1768_v2  ;;  %v528_v21 = vmul.f32 %v1773_v32, %v1384_v36  ;;  %v553_v8 = vmul.f32 %v1387_v37, %v1777_v42  ;;  %v2172_v13 = vld [vmem:[#allocation6_spill] sm:$0xff] }
  0x65   : > { %v870_v31 = vrot.slane %v846_v55, 4  ;;  %v716_v38 = vmul.f32 %v1788_v53, %v1428_v50  ;;  %v1804_v41 = vrot.slane %v1780_v43, %v2170_v14  ;;  %1191 = vst [vmem:[%s1568_s14 + $0x30] sm:$0xf] %v877_v54  ;;  %v690_v47 = vadd.f32 %v682_v11, %v502_v16 }
  0x66   : > { %v377_v4 = vsub.f32 %v348_v26, %v373_v29  ;;  %v557_v28 = vsub.f32 %v528_v21, %v553_v8  ;;  %v1809_v57 = vrot.slane %v1791_v44, %v2170_v14  ;;  %v1813_v22 = vrot.slane %v1794_v51, %v2170_v14 }
  0x67   : > { %2171 = vst [vmem:[#allocation15_spill] sm:$0xff] %v1804_v41  ;;  %v741_v34 = vmul.f32 %v1456_v60, %v1804_v41  ;;  %v1819_v55 = vrot.slane %v1738_v49, %v2172_v13  ;;  %v1823_v11 = vrot.slane %v1743_v45, %v2172_v13  ;;  %v1827_v26 = vrot.slane %v1752_v40, %v2172_v13 }
  0x68   : > { %v878_v29 = vadd.f32 %v870_v31, %v690_v47  ;;  %v577_v54 = vrot.slane %v557_v28, 4  ;;  %v904_v14 = vmul.f32 %v1809_v57, %v1459_v61  ;;  %v929_v16 = vmul.f32 %v1475_v3, %v1813_v22 }
  0x69   : > { %2173 = vst [vmem:[#allocation16_spill] sm:$0xff] %v1823_v11  ;;  %2174 = vst [vmem:[#allocation21_spill] sm:$0xff] %v1827_v26  ;;  %v745_v21 = vsub.f32 %v716_v38, %v741_v34  ;;  %v349_v8 = vmul.f32 %v1819_v55, %v1449_v56  ;;  %v374_v41 = vmul.f32 %v1466_v63, %v1823_v11 }
  0x6a   : > { %v529_v50 = vmul.f32 %v1827_v26, %v1482_v6  ;;  %1192 = vst [vmem:[%s1568_s14 + $0x38] sm:$0xf] %v878_v29  ;;  %v585_v60 = vadd.f32 %v577_v54, %v377_v4  ;;  %v933_v31 = vsub.f32 %v904_v14, %v929_v16  ;;  %v1842_v47 = vrot.slane %v1755_v27, %v2172_v13  ;;  %v2178_v26 = vld [vmem:[#allocation12_spill] sm:$0xff] }
  0x6b   : > { %v1846_v28 = vrot.slane %v1758_v39, %v2172_v13  ;;  %v378_v38 = vsub.f32 %v349_v8, %v374_v41  ;;  %v1850_v34 = vrot.slane %v1780_v43, %v2172_v13  ;;  %v1854_v11 = vrot.slane %v1791_v44, %v2172_v13 }
  0x6c   : > { %v1858_v4 = vrot.slane %v1794_v51, %v2172_v13  ;;  %v761_v29 = vadd.f32 %v745_v21, %v585_v60  ;;  %v953_v54 = vrot.slane %v933_v31, 4  ;;  %v554_v14 = vmul.f32 %v1485_v7, %v1842_v47 }
  0x6d   : > { %2175 = vst [vmem:[#allocation19_spill] sm:$0xff] %v1850_v34  ;;  %2176 = vst [vmem:[#allocation20_spill] sm:$0xff] %v1854_v11  ;;  %v717_v41 = vmul.f32 %v1846_v28, %v1494_v12  ;;  %v742_v16 = vmul.f32 %v1503_v20, %v1850_v34  ;;  %v905_v8 = vmul.f32 %v1854_v11, %v1512_v23 }
  0x6e   : > { %2177 = vst [vmem:[#allocation22_spill] sm:$0xff] %v1858_v4  ;;  %v930_v6 = vmul.f32 %v1525_v59, %v1858_v4  ;;  %v1872_v13 = vrot.slane %v1738_v49, %v2178_v26  ;;  %v961_v60 = vadd.f32 %v953_v54, %v761_v29  ;;  %v558_v21 = vsub.f32 %v529_v50, %v554_v14 }
  0x6f   : > { %v1876_v31 = vrot.slane %v1743_v45, %v2178_v26  ;;  %v1880_v34 = vrot.slane %v1752_v40, %v2178_v26  ;;  %v746_v12 = vsub.f32 %v717_v41, %v742_v16  ;;  %v1886_v59 = vrot.slane %v1755_v27, %v2178_v26 }
  0x70   : > { %v934_v23 = vsub.f32 %v905_v8, %v930_v6  ;;  %v350_v4 = vmul.f32 %v1872_v13, %v1540_v9  ;;  %v994_v29 = vrot.slane %v961_v60, 4  ;;  %v578_v54 = vrot.slane %v558_v21, 4 }
  0x71   : > { %2179 = vst [vmem:[#allocation24_spill] sm:$0xff] %v1880_v34  ;;  %2180 = vst [vmem:[#allocation25_spill] sm:$0xff] %v1886_v59  ;;  %v375_v50 = vmul.f32 %v1543_v10, %v1876_v31  ;;  %v530_v14 = vmul.f32 %v1880_v34, %v2152_v58  ;;  %v555_v41 = vmul.f32 %v1561_v19, %v1886_v59  ;;  %v2182_v34 = vld [vmem:[#allocation13_spill] sm:$0xff] }
  0x72   : > { %v954_v11 = vrot.slane %v934_v23, 4  ;;  %v1896_v6 = vrot.slane %v1758_v39, %v2178_v26  ;;  %v1900_v16 = vrot.slane %v1780_v43, %v2178_v26  ;;  %1002 = vst [vmem:[%s1568_s14] sm:$0xf0] %v994_v29  ;;  %v586_v8 = vadd.f32 %v578_v54, %v378_v38 }
  0x73   : > { %v379_v60 = vsub.f32 %v350_v4, %v375_v50  ;;  %v1905_v21 = vrot.slane %v1791_v44, %v2178_v26  ;;  %v1909_v23 = vrot.slane %v1794_v51, %v2178_v26  ;;  %v559_v59 = vsub.f32 %v530_v14, %v555_v41 }
  0x74   : > { %v718_v58 = vmul.f32 %v1896_v6, %v2155_v35  ;;  %v743_v19 = vmul.f32 %v2154_v24, %v1900_v16  ;;  %v1917_v29 = vrot.slane %v1738_v49, %v2182_v34  ;;  %v762_v38 = vadd.f32 %v746_v12, %v586_v8 }
  0x75   : > { %2181 = vst [vmem:[#allocation26_spill] sm:$0xff] %v1909_v23  ;;  %v906_v4 = vmul.f32 %v1905_v21, %v2158_v1  ;;  %v931_v54 = vmul.f32 %v1605_v0, %v1909_v23  ;;  %v1925_v26 = vrot.slane %v1743_v45, %v2182_v34  ;;  %v579_v50 = vrot.slane %v559_v59, 4 }
  0x76   : > { %v747_v14 = vsub.f32 %v718_v58, %v743_v19  ;;  %v351_v41 = vmul.f32 %v1917_v29, %v2160_v62  ;;  %v1931_v49 = vrot.slane %v1752_v40, %v2182_v34  ;;  %v962_v12 = vadd.f32 %v954_v11, %v762_v38 }
  0x77   : > { %v935_v8 = vsub.f32 %v906_v4, %v931_v54  ;;  %v376_v1 = vmul.f32 %v1623_v48, %v1925_v26  ;;  %v1937_v23 = vrot.slane %v1755_v27, %v2182_v34  ;;  %v587_v45 = vadd.f32 %v579_v50, %v379_v60 }
  0x78   : > { %v531_v59 = vmul.f32 %v1931_v49, %v2163_v15  ;;  %v1943_v19 = vrot.slane %v1758_v39, %v2182_v34  ;;  %v1947_v58 = vrot.slane %v1780_v43, %v2182_v34  ;;  %v995_v40 = vrot.slane %v962_v12, 4 }
  0x79   : > { %v955_v11 = vrot.slane %v935_v8, 4  ;;  %v380_v38 = vsub.f32 %v351_v41, %v376_v1  ;;  %v556_v4 = vmul.f32 %v1644_v17, %v1937_v23  ;;  %v763_v27 = vadd.f32 %v747_v14, %v587_v45 }
  0x7a   : > { %v719_v60 = vmul.f32 %v1943_v19, %v2166_v25  ;;  %v744_v54 = vmul.f32 %v1660_v46, %v1947_v58  ;;  %v1957_v39 = vrot.slane %v1791_v44, %v2182_v34  ;;  %1003 = vst [vmem:[%s1568_s14 + $0x8] sm:$0xf0] %v995_v40  ;;  %v1962_v50 = vrot.slane %v1794_v51, %v2182_v34  ;;  %v2185_v40 = vld [vmem:[#allocation15_spill] sm:$0xff] }
  0x7b   : > { %v560_v43 = vsub.f32 %v531_v59, %v556_v4  ;;  %v381_v1 = vmul.f32 %v1373_v33, %v1764_v5  ;;  %v385_v14 = vmul.f32 %v1768_v2, %v1364_v30  ;;  %v963_v41 = vadd.f32 %v955_v11, %v763_v27  ;;  %v2183_v30 = vld [vmem:[#allocation8_spill] sm:$0xff]  ;;  %v2184_v59 = vld [vmem:[#allocation7_spill] sm:$0xff] }
  0x7c   : > { %v748_v12 = vsub.f32 %v719_v60, %v744_v54  ;;  %v907_v8 = vmul.f32 %v1957_v39, %v2168_v52  ;;  %v561_v44 = vmul.f32 %v1387_v37, %v1773_v32  ;;  %v932_v51 = vmul.f32 %v1674_v18, %v1962_v50 }
  0x7d   : > { %v580_v45 = vrot.slane %v560_v43, 4  ;;  %v389_v34 = vadd.f32 %v385_v14, %v381_v1  ;;  %v565_v33 = vmul.f32 %v1777_v42, %v1384_v36  ;;  %v996_v5 = vrot.slane %v963_v41, 4  ;;  %v2186_v42 = vld [vmem:[#allocation16_spill] sm:$0xff]  ;;  %v2187_v43 = vld [vmem:[#allocation21_spill] sm:$0xff] }
  0x7e   : > { %v749_v2 = vmul.f32 %v2183_v30, %v1788_v53  ;;  %v753_v11 = vmul.f32 %v2185_v40, %v2184_v59  ;;  %v937_v4 = vmul.f32 %v1475_v3, %v1809_v57  ;;  %v936_v37 = vsub.f32 %v907_v8, %v932_v51  ;;  %v2188_v8 = vld [vmem:[#allocation9_spill] sm:$0xff]  ;;  %v2194_v59 = vld [vmem:[#allocation22_spill] sm:$0xff] }
  0x7f   : > { %v588_v27 = vadd.f32 %v580_v45, %v380_v38  ;;  %v569_v32 = vadd.f32 %v565_v33, %v561_v44  ;;  %v941_v60 = vmul.f32 %v1813_v22, %v1459_v61  ;;  %1004 = vst [vmem:[%s1568_s14 + $0x10] sm:$0xf0] %v996_v5  ;;  %v382_v36 = vmul.f32 %v1466_v63, %v1819_v55  ;;  %v2189_v22 = vld [vmem:[#allocation10_spill] sm:$0xff]  ;;  %v2190_v45 = vld [vmem:[#allocation19_spill] sm:$0xff]  ;;  %v2191_v33 = vld [vmem:[#allocation20_spill] sm:$0xff] }
  0x80   : > { %v757_v54 = vadd.f32 %v753_v11, %v749_v2  ;;  %v386_v53 = vmul.f32 %v2186_v42, %v1449_v56  ;;  %v562_v1 = vmul.f32 %v1485_v7, %v2187_v43  ;;  %v956_v41 = vrot.slane %v936_v37, 4  ;;  %v2192_v7 = vld [vmem:[#allocation14_spill] sm:$0xff]  ;;  %v2193_v2 = vld [vmem:[#allocation11_spill] sm:$0xff] }
  0x81   : > { %v764_v14 = vadd.f32 %v748_v12, %v588_v27  ;;  %v593_v3 = vrot.slane %v569_v32, 4  ;;  %v945_v57 = vadd.f32 %v941_v60, %v937_v4  ;;  %v566_v44 = vmul.f32 %v1842_v47, %v2188_v8  ;;  %v2195_v4 = vld [vmem:[#allocation24_spill] sm:$0xff]  ;;  %v2196_v27 = vld [vmem:[#allocation18_spill] sm:$0xff]  ;;  %v2197_v60 = vld [vmem:[#allocation17_spill] sm:$0xff] }
  0x82   : > { %v390_v38 = vadd.f32 %v386_v53, %v382_v36  ;;  %v750_v61 = vmul.f32 %v1503_v20, %v1846_v28  ;;  %v754_v63 = vmul.f32 %v2190_v45, %v2189_v22  ;;  %v938_v12 = vmul.f32 %v2192_v7, %v2191_v33  ;;  %v2198_v36 = vld [vmem:[#allocation25_spill] sm:$0xff] }
  0x83   : > { %v964_v55 = vadd.f32 %v956_v41, %v764_v14  ;;  %v601_v56 = vadd.f32 %v593_v3, %v389_v34  ;;  %v969_v51 = vrot.slane %v945_v57, 4  ;;  %v570_v5 = vadd.f32 %v566_v44, %v562_v1  ;;  %v2199_v14 = vld [vmem:[#allocation23_spill] sm:$0xff]  ;;  %v2200_v41 = vld [vmem:[#allocation26_spill] sm:$0xff] }
  0x84   : > { %v758_v30 = vadd.f32 %v754_v63, %v750_v61  ;;  %v942_v40 = vmul.f32 %v2194_v59, %v2193_v2  ;;  %v383_v47 = vmul.f32 %v1543_v10, %v1872_v13  ;;  %v387_v28 = vmul.f32 %v1876_v31, %v1540_v9 }
  0x85   : > { %v997_v11 = vrot.slane %v964_v55, 4  ;;  %v765_v20 = vadd.f32 %v757_v54, %v601_v56  ;;  %v563_v34 = vmul.f32 %v2196_v27, %v2195_v4  ;;  %v594_v37 = vrot.slane %v570_v5, 4 }
  0x86   : > { %v946_v32 = vadd.f32 %v942_v40, %v938_v12  ;;  %v567_v42 = vmul.f32 %v2198_v36, %v2197_v60  ;;  %v751_v53 = vmul.f32 %v2154_v24, %v1896_v6  ;;  %v391_v10 = vadd.f32 %v387_v28, %v383_v47 }
  0x87   : > { %1005 = vst [vmem:[%s1568_s14 + $0x18] sm:$0xf0] %v997_v11  ;;  %v977_v43 = vadd.f32 %v969_v51, %v765_v20  ;;  %v755_v13 = vmul.f32 %v1900_v16, %v2155_v35  ;;  %v939_v9 = vmul.f32 %v1605_v0, %v1905_v21  ;;  %v602_v31 = vadd.f32 %v594_v37, %v390_v38 }
  0x88   : > { %v970_v54 = vrot.slane %v946_v32, 4  ;;  %v571_v1 = vadd.f32 %v567_v42, %v563_v34  ;;  %v943_v3 = vmul.f32 %v2200_v41, %v2199_v14  ;;  %v384_v24 = vmul.f32 %v1623_v48, %v1917_v29 }
  0x89   : > { %v1010_v57 = vrot.slane %v977_v43, 4  ;;  %v759_v8 = vadd.f32 %v755_v13, %v751_v53  ;;  %v388_v6 = vmul.f32 %v1925_v26, %v2160_v62  ;;  %v766_v44 = vadd.f32 %v758_v30, %v602_v31 }
  0x8a   : > { %v595_v61 = vrot.slane %v571_v1, 4  ;;  %v947_v35 = vadd.f32 %v943_v3, %v939_v9  ;;  %v564_v0 = vmul.f32 %v1644_v17, %v1931_v49  ;;  %v568_v16 = vmul.f32 %v1937_v23, %v2163_v15 }
  0x8b   : > { %1193 = vst [vmem:[%s1568_s14 + $0x20] sm:$0xf0] %v1010_v57  ;;  %v752_v21 = vmul.f32 %v1660_v46, %v1943_v19  ;;  %v756_v48 = vmul.f32 %v1947_v58, %v2166_v25  ;;  %v978_v29 = vadd.f32 %v970_v54, %v766_v44  ;;  %v940_v26 = vmul.f32 %v1674_v18, %v1957_v39  ;;  %v1046_v39 = vld [vmem:[%s1568_s14 + $0x8] sm:$0xff] (%p1302_p5) }
  0x8c   : > { %v603_v38 = vadd.f32 %v595_v61, %v391_v10  ;;  %v971_v62 = vrot.slane %v947_v35, 4  ;;  %v392_v22 = vadd.f32 %v388_v6, %v384_v24  ;;  %v572_v17 = vadd.f32 %v568_v16, %v564_v0  ;;  %1047 = vst [vmem:[%s1031_s20 + $0x8] sm:$0xff] (%p1302_p5), %v1046_v39 }
  0x8d   : > { %v944_v49 = vmul.f32 %v1962_v50, %v2168_v52  ;;  %v1011_v15 = vrot.slane %v978_v29, 4  ;;  %v760_v46 = vadd.f32 %v756_v48, %v752_v21  ;;  %v1044_v52 = vld [vmem:[%s1568_s14] sm:$0xff] (%p1302_p5)  ;;  %v1048_v50 = vld [vmem:[%s1568_s14 + $0x10] sm:$0xff] (%p1302_p5) }
  0x8e   : > { %v767_v23 = vadd.f32 %v759_v8, %v603_v38  ;;  %v596_v45 = vrot.slane %v572_v17, 4  ;;  %v1050_v33 = vld [vmem:[%s1568_s14 + $0x18] sm:$0xff] (%p1302_p5)  ;;  %1045 = vst [vmem:[%s1031_s20] sm:$0xff] (%p1302_p5), %v1044_v52  ;;  %1049 = vst [vmem:[%s1031_s20 + $0x10] sm:$0xff] (%p1302_p5), %v1048_v50 }
  0x8f   : > { %v948_v19 = vadd.f32 %v944_v49, %v940_v26  ;;  %1194 = vst [vmem:[%s1568_s14 + $0x28] sm:$0xf0] %v1011_v15  ;;  %1051 = vst [vmem:[%s1031_s20 + $0x18] sm:$0xff] (%p1302_p5), %v1050_v33 }
  0x90   : > { %v979_v25 = vadd.f32 %v971_v62, %v767_v23  ;;  %v604_v58 = vadd.f32 %v596_v45, %v392_v22 }
  0x91   : > { %v972_v63 = vrot.slane %v948_v19, 4 }
  0x92   : > { %v1012_v55 = vrot.slane %v979_v25, 4  ;;  %v768_v56 = vadd.f32 %v760_v46, %v604_v58  ;;  %1028 = sbr.rel (!%p1302_p5) target bundleno = 161 (0xa1), region = 78  ;;  %v1052_v7 = vld [vmem:[%s1568_s14 + $0x20] sm:$0xff] (%p1302_p5) }
  0x93   : > { %1053 = vst [vmem:[%s1031_s20 + $0x80] sm:$0xff] (%p1302_p5), %v1052_v7 }
  0x94   : > { %1195 = vst [vmem:[%s1568_s14 + $0x30] sm:$0xf0] %v1012_v55  ;;  %v980_v51 = vadd.f32 %v972_v63, %v768_v56 }
  0x96   : > { %v1013_v18 = vrot.slane %v980_v51, 4  ;;  %v1054_v12 = vld [vmem:[%s1568_s14 + $0x28] sm:$0xff] (%p1302_p5) }
  0x97   : > { %1055 = vst [vmem:[%s1031_s20 + $0x88] sm:$0xff] (%p1302_p5), %v1054_v12 }
  0x98   : > { %1196 = vst [vmem:[%s1568_s14 + $0x38] sm:$0xf0] %v1013_v18 }
  0x9b   : > { %v1056_v5 = vld [vmem:[%s1568_s14 + $0x30] sm:$0xff] }
  0x9c   : > { %1057 = vst [vmem:[%s1031_s20 + $0x90] sm:$0xff] %v1056_v5 }
  0x9f   : > { %v1058_v30 = vld [vmem:[%s1568_s14 + $0x38] sm:$0xff] }
  0xa0   : > { %1059 = vst [vmem:[%s1031_s20 + $0x98] sm:$0xff] %v1058_v30 }
  0xa1 PF: > { %p9_p10 = scmp.ge.s32.totalorder %s1285_s13, 6   ;;  %s2201_s9 = smov %s1247_s10 }
  0xa2   : > { %s2202_s10 = smov %s1296_s16  ;;  %s2203_s11 = smov %s1285_s13 }
  0xa3   :  { %11 = sbr.rel (!%p9_p10) target bundleno = 2 (0x2), region = 157 }

// kernel: reverse.1
= control target key start
LH: loop header
LB: loop body
LE: loop exit
PB: predicated region body
PF: predicated region fallthrough
CT: control target
= control target key end

     0   :  { %s2312_s0 = inlined_call_operand.vmem [shape: f32[2,4,8,8,8,3], index: 0, kind: input, shape index: {}]   ;;  %s2313_s1 = inlined_call_operand.vmem [shape: f32[2,4,8,8,8,3], index: 1, kind: output, shape index: {}]  }
   0x1   :  { %v768_v0 = vld [vmem:[%s2312_s0 + $0x10] sm:$0xff]  ;;  %v783_v8 = vld [vmem:[%s2312_s0 + $0x28] sm:$0xff]  ;;  %v799_v16 = vld [vmem:[%s2312_s0 + $0x40] sm:$0xff] }
   0x2   :  { %v769_v1 = vld [vmem:[%s2312_s0 + $0x310] sm:$0xff]  ;;  %4 = vst [vmem:[%s2313_s1] sm:$0xff] %v768_v0  ;;  %784 = vst [vmem:[%s2313_s1 + $0x18] sm:$0xff] %v783_v8  ;;  %v785_v9 = vld [vmem:[%s2312_s0 + $0x328] sm:$0xff] }
   0x3   :  { %v771_v2 = vld [vmem:[%s2312_s0 + $0xd0] sm:$0xff]  ;;  %770 = vst [vmem:[%s2313_s1 + $0x300] sm:$0xff] %v769_v1  ;;  %v787_v10 = vld [vmem:[%s2312_s0 + $0xe8] sm:$0xff]  ;;  %786 = vst [vmem:[%s2313_s1 + $0x318] sm:$0xff] %v785_v9 }
   0x4   :  { %772 = vst [vmem:[%s2313_s1 + $0xc0] sm:$0xff] %v771_v2  ;;  %v773_v3 = vld [vmem:[%s2312_s0 + $0x3d0] sm:$0xff]  ;;  %v789_v11 = vld [vmem:[%s2312_s0 + $0x3e8] sm:$0xff]  ;;  %788 = vst [vmem:[%s2313_s1 + $0xd8] sm:$0xff] %v787_v10 }
   0x5   :  { %v775_v4 = vld [vmem:[%s2312_s0 + $0x190] sm:$0xff]  ;;  %774 = vst [vmem:[%s2313_s1 + $0x3c0] sm:$0xff] %v773_v3  ;;  %790 = vst [vmem:[%s2313_s1 + $0x3d8] sm:$0xff] %v789_v11  ;;  %v791_v12 = vld [vmem:[%s2312_s0 + $0x1a8] sm:$0xff] }
   0x6   :  { %v777_v5 = vld [vmem:[%s2312_s0 + $0x490] sm:$0xff]  ;;  %776 = vst [vmem:[%s2313_s1 + $0x180] sm:$0xff] %v775_v4  ;;  %v793_v13 = vld [vmem:[%s2312_s0 + $0x4a8] sm:$0xff]  ;;  %792 = vst [vmem:[%s2313_s1 + $0x198] sm:$0xff] %v791_v12 }
   0x7   :  { %778 = vst [vmem:[%s2313_s1 + $0x480] sm:$0xff] %v777_v5  ;;  %v779_v6 = vld [vmem:[%s2312_s0 + $0x250] sm:$0xff]  ;;  %v795_v14 = vld [vmem:[%s2312_s0 + $0x268] sm:$0xff]  ;;  %794 = vst [vmem:[%s2313_s1 + $0x498] sm:$0xff] %v793_v13 }
   0x8   :  { %v781_v7 = vld [vmem:[%s2312_s0 + $0x550] sm:$0xff]  ;;  %780 = vst [vmem:[%s2313_s1 + $0x240] sm:$0xff] %v779_v6  ;;  %796 = vst [vmem:[%s2313_s1 + $0x258] sm:$0xff] %v795_v14  ;;  %v797_v15 = vld [vmem:[%s2312_s0 + $0x568] sm:$0xff] }
   0x9   :  { %782 = vst [vmem:[%s2313_s1 + $0x540] sm:$0xff] %v781_v7  ;;  %v801_v17 = vld [vmem:[%s2312_s0 + $0x340] sm:$0xff]  ;;  %798 = vst [vmem:[%s2313_s1 + $0x558] sm:$0xff] %v797_v15  ;;  %v815_v24 = vld [vmem:[%s2312_s0 + $0x58] sm:$0xff] }
   0xa   :  { %800 = vst [vmem:[%s2313_s1 + $0x30] sm:$0xff] %v799_v16  ;;  %802 = vst [vmem:[%s2313_s1 + $0x330] sm:$0xff] %v801_v17  ;;  %v803_v18 = vld [vmem:[%s2312_s0 + $0x100] sm:$0xff]  ;;  %v817_v25 = vld [vmem:[%s2312_s0 + $0x358] sm:$0xff] }
   0xb   :  { %v805_v19 = vld [vmem:[%s2312_s0 + $0x400] sm:$0xff]  ;;  %804 = vst [vmem:[%s2313_s1 + $0xf0] sm:$0xff] %v803_v18  ;;  %v819_v26 = vld [vmem:[%s2312_s0 + $0x118] sm:$0xff]  ;;  %816 = vst [vmem:[%s2313_s1 + $0x48] sm:$0xff] %v815_v24 }
   0xc   :  { %v807_v20 = vld [vmem:[%s2312_s0 + $0x1c0] sm:$0xff]  ;;  %806 = vst [vmem:[%s2313_s1 + $0x3f0] sm:$0xff] %v805_v19  ;;  %818 = vst [vmem:[%s2313_s1 + $0x348] sm:$0xff] %v817_v25  ;;  %v821_v27 = vld [vmem:[%s2312_s0 + $0x418] sm:$0xff] }
   0xd   :  { %808 = vst [vmem:[%s2313_s1 + $0x1b0] sm:$0xff] %v807_v20  ;;  %v809_v21 = vld [vmem:[%s2312_s0 + $0x4c0] sm:$0xff]  ;;  %820 = vst [vmem:[%s2313_s1 + $0x108] sm:$0xff] %v819_v26  ;;  %v823_v28 = vld [vmem:[%s2312_s0 + $0x1d8] sm:$0xff] }
   0xe   :  { %v811_v22 = vld [vmem:[%s2312_s0 + $0x280] sm:$0xff]  ;;  %810 = vst [vmem:[%s2313_s1 + $0x4b0] sm:$0xff] %v809_v21  ;;  %v825_v29 = vld [vmem:[%s2312_s0 + $0x4d8] sm:$0xff]  ;;  %822 = vst [vmem:[%s2313_s1 + $0x408] sm:$0xff] %v821_v27 }
   0xf   :  { %v813_v23 = vld [vmem:[%s2312_s0 + $0x580] sm:$0xff]  ;;  %812 = vst [vmem:[%s2313_s1 + $0x270] sm:$0xff] %v811_v22  ;;  %824 = vst [vmem:[%s2313_s1 + $0x1c8] sm:$0xff] %v823_v28  ;;  %v827_v30 = vld [vmem:[%s2312_s0 + $0x298] sm:$0xff] }
  0x10   :  { %814 = vst [vmem:[%s2313_s1 + $0x570] sm:$0xff] %v813_v23  ;;  %826 = vst [vmem:[%s2313_s1 + $0x4c8] sm:$0xff] %v825_v29  ;;  %v829_v31 = vld [vmem:[%s2312_s0 + $0x598] sm:$0xff]  ;;  %v831_v32 = vld [vmem:[%s2312_s0 + $0x70] sm:$0xff] }
  0x11   :  { %828 = vst [vmem:[%s2313_s1 + $0x288] sm:$0xff] %v827_v30  ;;  %830 = vst [vmem:[%s2313_s1 + $0x588] sm:$0xff] %v829_v31  ;;  %v833_v33 = vld [vmem:[%s2312_s0 + $0x370] sm:$0xff]  ;;  %v847_v40 = vld [vmem:[%s2312_s0 + $0x88] sm:$0xff] }
  0x12   :  { %832 = vst [vmem:[%s2313_s1 + $0x60] sm:$0xff] %v831_v32  ;;  %v835_v34 = vld [vmem:[%s2312_s0 + $0x130] sm:$0xff]  ;;  %834 = vst [vmem:[%s2313_s1 + $0x360] sm:$0xff] %v833_v33  ;;  %v849_v41 = vld [vmem:[%s2312_s0 + $0x388] sm:$0xff] }
  0x13   :  { %v837_v35 = vld [vmem:[%s2312_s0 + $0x430] sm:$0xff]  ;;  %836 = vst [vmem:[%s2313_s1 + $0x120] sm:$0xff] %v835_v34  ;;  %848 = vst [vmem:[%s2313_s1 + $0x78] sm:$0xff] %v847_v40  ;;  %v851_v42 = vld [vmem:[%s2312_s0 + $0x148] sm:$0xff] }
  0x14   :  { %838 = vst [vmem:[%s2313_s1 + $0x420] sm:$0xff] %v837_v35  ;;  %v839_v36 = vld [vmem:[%s2312_s0 + $0x1f0] sm:$0xff]  ;;  %850 = vst [vmem:[%s2313_s1 + $0x378] sm:$0xff] %v849_v41  ;;  %v853_v43 = vld [vmem:[%s2312_s0 + $0x448] sm:$0xff] }
  0x15   :  { %v841_v37 = vld [vmem:[%s2312_s0 + $0x4f0] sm:$0xff]  ;;  %840 = vst [vmem:[%s2313_s1 + $0x1e0] sm:$0xff] %v839_v36  ;;  %v855_v44 = vld [vmem:[%s2312_s0 + $0x208] sm:$0xff]  ;;  %852 = vst [vmem:[%s2313_s1 + $0x138] sm:$0xff] %v851_v42 }
  0x16   :  { %v843_v38 = vld [vmem:[%s2312_s0 + $0x2b0] sm:$0xff]  ;;  %842 = vst [vmem:[%s2313_s1 + $0x4e0] sm:$0xff] %v841_v37  ;;  %854 = vst [vmem:[%s2313_s1 + $0x438] sm:$0xff] %v853_v43  ;;  %v857_v45 = vld [vmem:[%s2312_s0 + $0x508] sm:$0xff] }
  0x17   :  { %844 = vst [vmem:[%s2313_s1 + $0x2a0] sm:$0xff] %v843_v38  ;;  %v845_v39 = vld [vmem:[%s2312_s0 + $0x5b0] sm:$0xff]  ;;  %856 = vst [vmem:[%s2313_s1 + $0x1f8] sm:$0xff] %v855_v44  ;;  %v859_v46 = vld [vmem:[%s2312_s0 + $0x2c8] sm:$0xff] }
  0x18   :  { %846 = vst [vmem:[%s2313_s1 + $0x5a0] sm:$0xff] %v845_v39  ;;  %v861_v47 = vld [vmem:[%s2312_s0 + $0x5c8] sm:$0xff]  ;;  %858 = vst [vmem:[%s2313_s1 + $0x4f8] sm:$0xff] %v857_v45  ;;  %v863_v48 = vld [vmem:[%s2312_s0 + $0xa0] sm:$0xff] }
  0x19   :  { %860 = vst [vmem:[%s2313_s1 + $0x2b8] sm:$0xff] %v859_v46  ;;  %862 = vst [vmem:[%s2313_s1 + $0x5b8] sm:$0xff] %v861_v47  ;;  %v865_v49 = vld [vmem:[%s2312_s0 + $0x3a0] sm:$0xff]  ;;  %v879_v56 = vld [vmem:[%s2312_s0 + $0xb8] sm:$0xff] }
  0x1a   :  { %v867_v50 = vld [vmem:[%s2312_s0 + $0x160] sm:$0xff]  ;;  %864 = vst [vmem:[%s2313_s1 + $0x90] sm:$0xff] %v863_v48  ;;  %866 = vst [vmem:[%s2313_s1 + $0x390] sm:$0xff] %v865_v49  ;;  %v881_v57 = vld [vmem:[%s2312_s0 + $0x3b8] sm:$0xff] }
  0x1b   :  { %868 = vst [vmem:[%s2313_s1 + $0x150] sm:$0xff] %v867_v50  ;;  %v869_v51 = vld [vmem:[%s2312_s0 + $0x460] sm:$0xff]  ;;  %880 = vst [vmem:[%s2313_s1 + $0xa8] sm:$0xff] %v879_v56  ;;  %v883_v58 = vld [vmem:[%s2312_s0 + $0x178] sm:$0xff] }
  0x1c   :  { %v871_v52 = vld [vmem:[%s2312_s0 + $0x220] sm:$0xff]  ;;  %870 = vst [vmem:[%s2313_s1 + $0x450] sm:$0xff] %v869_v51  ;;  %v885_v59 = vld [vmem:[%s2312_s0 + $0x478] sm:$0xff]  ;;  %882 = vst [vmem:[%s2313_s1 + $0x3a8] sm:$0xff] %v881_v57 }
  0x1d   :  { %v873_v53 = vld [vmem:[%s2312_s0 + $0x520] sm:$0xff]  ;;  %872 = vst [vmem:[%s2313_s1 + $0x210] sm:$0xff] %v871_v52  ;;  %884 = vst [vmem:[%s2313_s1 + $0x168] sm:$0xff] %v883_v58  ;;  %v887_v60 = vld [vmem:[%s2312_s0 + $0x238] sm:$0xff] }
  0x1e   :  { %874 = vst [vmem:[%s2313_s1 + $0x510] sm:$0xff] %v873_v53  ;;  %v875_v54 = vld [vmem:[%s2312_s0 + $0x2e0] sm:$0xff]  ;;  %886 = vst [vmem:[%s2313_s1 + $0x468] sm:$0xff] %v885_v59  ;;  %v889_v61 = vld [vmem:[%s2312_s0 + $0x538] sm:$0xff] }
  0x1f   :  { %v877_v55 = vld [vmem:[%s2312_s0 + $0x5e0] sm:$0xff]  ;;  %876 = vst [vmem:[%s2313_s1 + $0x2d0] sm:$0xff] %v875_v54  ;;  %v891_v62 = vld [vmem:[%s2312_s0 + $0x2f8] sm:$0xff]  ;;  %888 = vst [vmem:[%s2313_s1 + $0x228] sm:$0xff] %v887_v60 }
  0x20   :  { %878 = vst [vmem:[%s2313_s1 + $0x5d0] sm:$0xff] %v877_v55  ;;  %890 = vst [vmem:[%s2313_s1 + $0x528] sm:$0xff] %v889_v61  ;;  %v893_v63 = vld [vmem:[%s2312_s0 + $0x5f8] sm:$0xff]  ;;  %v895_v0 = vld [vmem:[%s2312_s0 + $0x8] sm:$0xff] }
  0x21   :  { %892 = vst [vmem:[%s2313_s1 + $0x2e8] sm:$0xff] %v891_v62  ;;  %v897_v1 = vld [vmem:[%s2312_s0 + $0x308] sm:$0xff]  ;;  %894 = vst [vmem:[%s2313_s1 + $0x5e8] sm:$0xff] %v893_v63  ;;  %v911_v8 = vld [vmem:[%s2312_s0 + $0x20] sm:$0xff] }
  0x22   :  { %896 = vst [vmem:[%s2313_s1 + $0x8] sm:$0xff] %v895_v0  ;;  %898 = vst [vmem:[%s2313_s1 + $0x308] sm:$0xff] %v897_v1  ;;  %v899_v2 = vld [vmem:[%s2312_s0 + $0xc8] sm:$0xff]  ;;  %v913_v9 = vld [vmem:[%s2312_s0 + $0x320] sm:$0xff] }
  0x23   :  { %v901_v3 = vld [vmem:[%s2312_s0 + $0x3c8] sm:$0xff]  ;;  %900 = vst [vmem:[%s2313_s1 + $0xc8] sm:$0xff] %v899_v2  ;;  %v915_v10 = vld [vmem:[%s2312_s0 + $0xe0] sm:$0xff]  ;;  %912 = vst [vmem:[%s2313_s1 + $0x20] sm:$0xff] %v911_v8 }
  0x24   :  { %v903_v4 = vld [vmem:[%s2312_s0 + $0x188] sm:$0xff]  ;;  %902 = vst [vmem:[%s2313_s1 + $0x3c8] sm:$0xff] %v901_v3  ;;  %914 = vst [vmem:[%s2313_s1 + $0x320] sm:$0xff] %v913_v9  ;;  %v917_v11 = vld [vmem:[%s2312_s0 + $0x3e0] sm:$0xff] }
  0x25   :  { %904 = vst [vmem:[%s2313_s1 + $0x188] sm:$0xff] %v903_v4  ;;  %v905_v5 = vld [vmem:[%s2312_s0 + $0x488] sm:$0xff]  ;;  %916 = vst [vmem:[%s2313_s1 + $0xe0] sm:$0xff] %v915_v10  ;;  %v919_v12 = vld [vmem:[%s2312_s0 + $0x1a0] sm:$0xff] }
  0x26   :  { %v907_v6 = vld [vmem:[%s2312_s0 + $0x248] sm:$0xff]  ;;  %906 = vst [vmem:[%s2313_s1 + $0x488] sm:$0xff] %v905_v5  ;;  %v921_v13 = vld [vmem:[%s2312_s0 + $0x4a0] sm:$0xff]  ;;  %918 = vst [vmem:[%s2313_s1 + $0x3e0] sm:$0xff] %v917_v11 }
  0x27   :  { %v909_v7 = vld [vmem:[%s2312_s0 + $0x548] sm:$0xff]  ;;  %908 = vst [vmem:[%s2313_s1 + $0x248] sm:$0xff] %v907_v6  ;;  %920 = vst [vmem:[%s2313_s1 + $0x1a0] sm:$0xff] %v919_v12  ;;  %v923_v14 = vld [vmem:[%s2312_s0 + $0x260] sm:$0xff] }
  0x28   :  { %910 = vst [vmem:[%s2313_s1 + $0x548] sm:$0xff] %v909_v7  ;;  %922 = vst [vmem:[%s2313_s1 + $0x4a0] sm:$0xff] %v921_v13  ;;  %v925_v15 = vld [vmem:[%s2312_s0 + $0x560] sm:$0xff]  ;;  %v927_v16 = vld [vmem:[%s2312_s0 + $0x38] sm:$0xff] }
  0x29   :  { %924 = vst [vmem:[%s2313_s1 + $0x260] sm:$0xff] %v923_v14  ;;  %926 = vst [vmem:[%s2313_s1 + $0x560] sm:$0xff] %v925_v15  ;;  %v929_v17 = vld [vmem:[%s2312_s0 + $0x338] sm:$0xff]  ;;  %v943_v24 = vld [vmem:[%s2312_s0 + $0x50] sm:$0xff] }
  0x2a   :  { %928 = vst [vmem:[%s2313_s1 + $0x38] sm:$0xff] %v927_v16  ;;  %v931_v18 = vld [vmem:[%s2312_s0 + $0xf8] sm:$0xff]  ;;  %930 = vst [vmem:[%s2313_s1 + $0x338] sm:$0xff] %v929_v17  ;;  %v945_v25 = vld [vmem:[%s2312_s0 + $0x350] sm:$0xff] }
  0x2b   :  { %v933_v19 = vld [vmem:[%s2312_s0 + $0x3f8] sm:$0xff]  ;;  %932 = vst [vmem:[%s2313_s1 + $0xf8] sm:$0xff] %v931_v18  ;;  %944 = vst [vmem:[%s2313_s1 + $0x50] sm:$0xff] %v943_v24  ;;  %v947_v26 = vld [vmem:[%s2312_s0 + $0x110] sm:$0xff] }
  0x2c   :  { %934 = vst [vmem:[%s2313_s1 + $0x3f8] sm:$0xff] %v933_v19  ;;  %v935_v20 = vld [vmem:[%s2312_s0 + $0x1b8] sm:$0xff]  ;;  %946 = vst [vmem:[%s2313_s1 + $0x350] sm:$0xff] %v945_v25  ;;  %v949_v27 = vld [vmem:[%s2312_s0 + $0x410] sm:$0xff] }
  0x2d   :  { %v937_v21 = vld [vmem:[%s2312_s0 + $0x4b8] sm:$0xff]  ;;  %936 = vst [vmem:[%s2313_s1 + $0x1b8] sm:$0xff] %v935_v20  ;;  %v951_v28 = vld [vmem:[%s2312_s0 + $0x1d0] sm:$0xff]  ;;  %948 = vst [vmem:[%s2313_s1 + $0x110] sm:$0xff] %v947_v26 }
  0x2e   :  { %v939_v22 = vld [vmem:[%s2312_s0 + $0x278] sm:$0xff]  ;;  %938 = vst [vmem:[%s2313_s1 + $0x4b8] sm:$0xff] %v937_v21  ;;  %950 = vst [vmem:[%s2313_s1 + $0x410] sm:$0xff] %v949_v27  ;;  %v953_v29 = vld [vmem:[%s2312_s0 + $0x4d0] sm:$0xff] }
  0x2f   :  { %940 = vst [vmem:[%s2313_s1 + $0x278] sm:$0xff] %v939_v22  ;;  %v941_v23 = vld [vmem:[%s2312_s0 + $0x578] sm:$0xff]  ;;  %952 = vst [vmem:[%s2313_s1 + $0x1d0] sm:$0xff] %v951_v28  ;;  %v955_v30 = vld [vmem:[%s2312_s0 + $0x290] sm:$0xff] }
  0x30   :  { %942 = vst [vmem:[%s2313_s1 + $0x578] sm:$0xff] %v941_v23  ;;  %v957_v31 = vld [vmem:[%s2312_s0 + $0x590] sm:$0xff]  ;;  %954 = vst [vmem:[%s2313_s1 + $0x4d0] sm:$0xff] %v953_v29  ;;  %v959_v32 = vld [vmem:[%s2312_s0 + $0x68] sm:$0xff] }
  0x31   :  { %956 = vst [vmem:[%s2313_s1 + $0x290] sm:$0xff] %v955_v30  ;;  %958 = vst [vmem:[%s2313_s1 + $0x590] sm:$0xff] %v957_v31  ;;  %v961_v33 = vld [vmem:[%s2312_s0 + $0x368] sm:$0xff]  ;;  %v975_v40 = vld [vmem:[%s2312_s0 + $0x80] sm:$0xff] }
  0x32   :  { %v963_v34 = vld [vmem:[%s2312_s0 + $0x128] sm:$0xff]  ;;  %960 = vst [vmem:[%s2313_s1 + $0x68] sm:$0xff] %v959_v32  ;;  %962 = vst [vmem:[%s2313_s1 + $0x368] sm:$0xff] %v961_v33  ;;  %v977_v41 = vld [vmem:[%s2312_s0 + $0x380] sm:$0xff] }
  0x33   :  { %964 = vst [vmem:[%s2313_s1 + $0x128] sm:$0xff] %v963_v34  ;;  %v965_v35 = vld [vmem:[%s2312_s0 + $0x428] sm:$0xff]  ;;  %976 = vst [vmem:[%s2313_s1 + $0x80] sm:$0xff] %v975_v40  ;;  %v979_v42 = vld [vmem:[%s2312_s0 + $0x140] sm:$0xff] }
  0x34   :  { %v967_v36 = vld [vmem:[%s2312_s0 + $0x1e8] sm:$0xff]  ;;  %966 = vst [vmem:[%s2313_s1 + $0x428] sm:$0xff] %v965_v35  ;;  %v981_v43 = vld [vmem:[%s2312_s0 + $0x440] sm:$0xff]  ;;  %978 = vst [vmem:[%s2313_s1 + $0x380] sm:$0xff] %v977_v41 }
  0x35   :  { %v969_v37 = vld [vmem:[%s2312_s0 + $0x4e8] sm:$0xff]  ;;  %968 = vst [vmem:[%s2313_s1 + $0x1e8] sm:$0xff] %v967_v36  ;;  %980 = vst [vmem:[%s2313_s1 + $0x140] sm:$0xff] %v979_v42  ;;  %v983_v44 = vld [vmem:[%s2312_s0 + $0x200] sm:$0xff] }
  0x36   :  { %970 = vst [vmem:[%s2313_s1 + $0x4e8] sm:$0xff] %v969_v37  ;;  %v971_v38 = vld [vmem:[%s2312_s0 + $0x2a8] sm:$0xff]  ;;  %982 = vst [vmem:[%s2313_s1 + $0x440] sm:$0xff] %v981_v43  ;;  %v985_v45 = vld [vmem:[%s2312_s0 + $0x500] sm:$0xff] }
  0x37   :  { %v973_v39 = vld [vmem:[%s2312_s0 + $0x5a8] sm:$0xff]  ;;  %972 = vst [vmem:[%s2313_s1 + $0x2a8] sm:$0xff] %v971_v38  ;;  %v987_v46 = vld [vmem:[%s2312_s0 + $0x2c0] sm:$0xff]  ;;  %984 = vst [vmem:[%s2313_s1 + $0x200] sm:$0xff] %v983_v44 }
  0x38   :  { %974 = vst [vmem:[%s2313_s1 + $0x5a8] sm:$0xff] %v973_v39  ;;  %986 = vst [vmem:[%s2313_s1 + $0x500] sm:$0xff] %v985_v45  ;;  %v989_v47 = vld [vmem:[%s2312_s0 + $0x5c0] sm:$0xff]  ;;  %v991_v48 = vld [vmem:[%s2312_s0 + $0x98] sm:$0xff] }
  0x39   :  { %988 = vst [vmem:[%s2313_s1 + $0x2c0] sm:$0xff] %v987_v46  ;;  %v993_v49 = vld [vmem:[%s2312_s0 + $0x398] sm:$0xff]  ;;  %990 = vst [vmem:[%s2313_s1 + $0x5c0] sm:$0xff] %v989_v47  ;;  %v1007_v56 = vld [vmem:[%s2312_s0 + $0xb0] sm:$0xff] }
  0x3a   :  { %992 = vst [vmem:[%s2313_s1 + $0x98] sm:$0xff] %v991_v48  ;;  %994 = vst [vmem:[%s2313_s1 + $0x398] sm:$0xff] %v993_v49  ;;  %v995_v50 = vld [vmem:[%s2312_s0 + $0x158] sm:$0xff]  ;;  %v1009_v57 = vld [vmem:[%s2312_s0 + $0x3b0] sm:$0xff] }
  0x3b   :  { %v997_v51 = vld [vmem:[%s2312_s0 + $0x458] sm:$0xff]  ;;  %996 = vst [vmem:[%s2313_s1 + $0x158] sm:$0xff] %v995_v50  ;;  %v1011_v58 = vld [vmem:[%s2312_s0 + $0x170] sm:$0xff]  ;;  %1008 = vst [vmem:[%s2313_s1 + $0xb0] sm:$0xff] %v1007_v56 }
  0x3c   :  { %v999_v52 = vld [vmem:[%s2312_s0 + $0x218] sm:$0xff]  ;;  %998 = vst [vmem:[%s2313_s1 + $0x458] sm:$0xff] %v997_v51  ;;  %1010 = vst [vmem:[%s2313_s1 + $0x3b0] sm:$0xff] %v1009_v57  ;;  %v1013_v59 = vld [vmem:[%s2312_s0 + $0x470] sm:$0xff] }
  0x3d   :  { %1000 = vst [vmem:[%s2313_s1 + $0x218] sm:$0xff] %v999_v52  ;;  %v1001_v53 = vld [vmem:[%s2312_s0 + $0x518] sm:$0xff]  ;;  %1012 = vst [vmem:[%s2313_s1 + $0x170] sm:$0xff] %v1011_v58  ;;  %v1015_v60 = vld [vmem:[%s2312_s0 + $0x230] sm:$0xff] }
  0x3e   :  { %v1003_v54 = vld [vmem:[%s2312_s0 + $0x2d8] sm:$0xff]  ;;  %1002 = vst [vmem:[%s2313_s1 + $0x518] sm:$0xff] %v1001_v53  ;;  %v1017_v61 = vld [vmem:[%s2312_s0 + $0x530] sm:$0xff]  ;;  %1014 = vst [vmem:[%s2313_s1 + $0x470] sm:$0xff] %v1013_v59 }
  0x3f   :  { %v1005_v55 = vld [vmem:[%s2312_s0 + $0x5d8] sm:$0xff]  ;;  %1004 = vst [vmem:[%s2313_s1 + $0x2d8] sm:$0xff] %v1003_v54  ;;  %1016 = vst [vmem:[%s2313_s1 + $0x230] sm:$0xff] %v1015_v60  ;;  %v1019_v62 = vld [vmem:[%s2312_s0 + $0x2f0] sm:$0xff] }
  0x40   :  { %1006 = vst [vmem:[%s2313_s1 + $0x5d8] sm:$0xff] %v1005_v55  ;;  %1018 = vst [vmem:[%s2313_s1 + $0x530] sm:$0xff] %v1017_v61  ;;  %v1021_v63 = vld [vmem:[%s2312_s0 + $0x5f0] sm:$0xff]  ;;  %v513_v0 = vld [vmem:[%s2312_s0] sm:$0xff] }
  0x41   :  { %1020 = vst [vmem:[%s2313_s1 + $0x2f0] sm:$0xff] %v1019_v62  ;;  %1022 = vst [vmem:[%s2313_s1 + $0x5f0] sm:$0xff] %v1021_v63  ;;  %v1024_v1 = vld [vmem:[%s2312_s0 + $0x300] sm:$0xff]  ;;  %v1038_v8 = vld [vmem:[%s2312_s0 + $0x18] sm:$0xff] }
  0x42   :  { %1023 = vst [vmem:[%s2313_s1 + $0x10] sm:$0xff] %v513_v0  ;;  %v1026_v2 = vld [vmem:[%s2312_s0 + $0xc0] sm:$0xff]  ;;  %1025 = vst [vmem:[%s2313_s1 + $0x310] sm:$0xff] %v1024_v1  ;;  %v1040_v9 = vld [vmem:[%s2312_s0 + $0x318] sm:$0xff] }
  0x43   :  { %v1028_v3 = vld [vmem:[%s2312_s0 + $0x3c0] sm:$0xff]  ;;  %1027 = vst [vmem:[%s2313_s1 + $0xd0] sm:$0xff] %v1026_v2  ;;  %1039 = vst [vmem:[%s2313_s1 + $0x28] sm:$0xff] %v1038_v8  ;;  %v1042_v10 = vld [vmem:[%s2312_s0 + $0xd8] sm:$0xff] }
  0x44   :  { %1029 = vst [vmem:[%s2313_s1 + $0x3d0] sm:$0xff] %v1028_v3  ;;  %v1030_v4 = vld [vmem:[%s2312_s0 + $0x180] sm:$0xff]  ;;  %1041 = vst [vmem:[%s2313_s1 + $0x328] sm:$0xff] %v1040_v9  ;;  %v1044_v11 = vld [vmem:[%s2312_s0 + $0x3d8] sm:$0xff] }
  0x45   :  { %v1032_v5 = vld [vmem:[%s2312_s0 + $0x480] sm:$0xff]  ;;  %1031 = vst [vmem:[%s2313_s1 + $0x190] sm:$0xff] %v1030_v4  ;;  %v1046_v12 = vld [vmem:[%s2312_s0 + $0x198] sm:$0xff]  ;;  %1043 = vst [vmem:[%s2313_s1 + $0xe8] sm:$0xff] %v1042_v10 }
  0x46   :  { %v1034_v6 = vld [vmem:[%s2312_s0 + $0x240] sm:$0xff]  ;;  %1033 = vst [vmem:[%s2313_s1 + $0x490] sm:$0xff] %v1032_v5  ;;  %1045 = vst [vmem:[%s2313_s1 + $0x3e8] sm:$0xff] %v1044_v11  ;;  %v1048_v13 = vld [vmem:[%s2312_s0 + $0x498] sm:$0xff] }
  0x47   :  { %1035 = vst [vmem:[%s2313_s1 + $0x250] sm:$0xff] %v1034_v6  ;;  %v1036_v7 = vld [vmem:[%s2312_s0 + $0x540] sm:$0xff]  ;;  %1047 = vst [vmem:[%s2313_s1 + $0x1a8] sm:$0xff] %v1046_v12  ;;  %v1050_v14 = vld [vmem:[%s2312_s0 + $0x258] sm:$0xff] }
  0x48   :  { %1037 = vst [vmem:[%s2313_s1 + $0x550] sm:$0xff] %v1036_v7  ;;  %v1052_v15 = vld [vmem:[%s2312_s0 + $0x558] sm:$0xff]  ;;  %1049 = vst [vmem:[%s2313_s1 + $0x4a8] sm:$0xff] %v1048_v13  ;;  %v1054_v16 = vld [vmem:[%s2312_s0 + $0x30] sm:$0xff] }
  0x49   :  { %1051 = vst [vmem:[%s2313_s1 + $0x268] sm:$0xff] %v1050_v14  ;;  %1053 = vst [vmem:[%s2313_s1 + $0x568] sm:$0xff] %v1052_v15  ;;  %v1056_v17 = vld [vmem:[%s2312_s0 + $0x330] sm:$0xff]  ;;  %v1070_v24 = vld [vmem:[%s2312_s0 + $0x48] sm:$0xff] }
  0x4a   :  { %v1058_v18 = vld [vmem:[%s2312_s0 + $0xf0] sm:$0xff]  ;;  %1055 = vst [vmem:[%s2313_s1 + $0x40] sm:$0xff] %v1054_v16  ;;  %1057 = vst [vmem:[%s2313_s1 + $0x340] sm:$0xff] %v1056_v17  ;;  %v1072_v25 = vld [vmem:[%s2312_s0 + $0x348] sm:$0xff] }
  0x4b   :  { %1059 = vst [vmem:[%s2313_s1 + $0x100] sm:$0xff] %v1058_v18  ;;  %v1060_v19 = vld [vmem:[%s2312_s0 + $0x3f0] sm:$0xff]  ;;  %1071 = vst [vmem:[%s2313_s1 + $0x58] sm:$0xff] %v1070_v24  ;;  %v1074_v26 = vld [vmem:[%s2312_s0 + $0x108] sm:$0xff] }
  0x4c   :  { %v1062_v20 = vld [vmem:[%s2312_s0 + $0x1b0] sm:$0xff]  ;;  %1061 = vst [vmem:[%s2313_s1 + $0x400] sm:$0xff] %v1060_v19  ;;  %v1076_v27 = vld [vmem:[%s2312_s0 + $0x408] sm:$0xff]  ;;  %1073 = vst [vmem:[%s2313_s1 + $0x358] sm:$0xff] %v1072_v25 }
  0x4d   :  { %v1064_v21 = vld [vmem:[%s2312_s0 + $0x4b0] sm:$0xff]  ;;  %1063 = vst [vmem:[%s2313_s1 + $0x1c0] sm:$0xff] %v1062_v20  ;;  %1075 = vst [vmem:[%s2313_s1 + $0x118] sm:$0xff] %v1074_v26  ;;  %v1078_v28 = vld [vmem:[%s2312_s0 + $0x1c8] sm:$0xff] }
  0x4e   :  { %1065 = vst [vmem:[%s2313_s1 + $0x4c0] sm:$0xff] %v1064_v21  ;;  %v1066_v22 = vld [vmem:[%s2312_s0 + $0x270] sm:$0xff]  ;;  %1077 = vst [vmem:[%s2313_s1 + $0x418] sm:$0xff] %v1076_v27  ;;  %v1080_v29 = vld [vmem:[%s2312_s0 + $0x4c8] sm:$0xff] }
  0x4f   :  { %v1068_v23 = vld [vmem:[%s2312_s0 + $0x570] sm:$0xff]  ;;  %1067 = vst [vmem:[%s2313_s1 + $0x280] sm:$0xff] %v1066_v22  ;;  %v1082_v30 = vld [vmem:[%s2312_s0 + $0x288] sm:$0xff]  ;;  %1079 = vst [vmem:[%s2313_s1 + $0x1d8] sm:$0xff] %v1078_v28 }
  0x50   :  { %1069 = vst [vmem:[%s2313_s1 + $0x580] sm:$0xff] %v1068_v23  ;;  %1081 = vst [vmem:[%s2313_s1 + $0x4d8] sm:$0xff] %v1080_v29  ;;  %v1084_v31 = vld [vmem:[%s2312_s0 + $0x588] sm:$0xff]  ;;  %v1086_v32 = vld [vmem:[%s2312_s0 + $0x60] sm:$0xff] }
  0x51   :  { %1083 = vst [vmem:[%s2313_s1 + $0x298] sm:$0xff] %v1082_v30  ;;  %v1088_v33 = vld [vmem:[%s2312_s0 + $0x360] sm:$0xff]  ;;  %1085 = vst [vmem:[%s2313_s1 + $0x598] sm:$0xff] %v1084_v31  ;;  %v1102_v40 = vld [vmem:[%s2312_s0 + $0x78] sm:$0xff] }
  0x52   :  { %1087 = vst [vmem:[%s2313_s1 + $0x70] sm:$0xff] %v1086_v32  ;;  %1089 = vst [vmem:[%s2313_s1 + $0x370] sm:$0xff] %v1088_v33  ;;  %v1090_v34 = vld [vmem:[%s2312_s0 + $0x120] sm:$0xff]  ;;  %v1104_v41 = vld [vmem:[%s2312_s0 + $0x378] sm:$0xff] }
  0x53   :  { %v1092_v35 = vld [vmem:[%s2312_s0 + $0x420] sm:$0xff]  ;;  %1091 = vst [vmem:[%s2313_s1 + $0x130] sm:$0xff] %v1090_v34  ;;  %v1106_v42 = vld [vmem:[%s2312_s0 + $0x138] sm:$0xff]  ;;  %1103 = vst [vmem:[%s2313_s1 + $0x88] sm:$0xff] %v1102_v40 }
  0x54   :  { %v1094_v36 = vld [vmem:[%s2312_s0 + $0x1e0] sm:$0xff]  ;;  %1093 = vst [vmem:[%s2313_s1 + $0x430] sm:$0xff] %v1092_v35  ;;  %1105 = vst [vmem:[%s2313_s1 + $0x388] sm:$0xff] %v1104_v41  ;;  %v1108_v43 = vld [vmem:[%s2312_s0 + $0x438] sm:$0xff] }
  0x55   :  { %1095 = vst [vmem:[%s2313_s1 + $0x1f0] sm:$0xff] %v1094_v36  ;;  %v1096_v37 = vld [vmem:[%s2312_s0 + $0x4e0] sm:$0xff]  ;;  %1107 = vst [vmem:[%s2313_s1 + $0x148] sm:$0xff] %v1106_v42  ;;  %v1110_v44 = vld [vmem:[%s2312_s0 + $0x1f8] sm:$0xff] }
  0x56   :  { %v1098_v38 = vld [vmem:[%s2312_s0 + $0x2a0] sm:$0xff]  ;;  %1097 = vst [vmem:[%s2313_s1 + $0x4f0] sm:$0xff] %v1096_v37  ;;  %v1112_v45 = vld [vmem:[%s2312_s0 + $0x4f8] sm:$0xff]  ;;  %1109 = vst [vmem:[%s2313_s1 + $0x448] sm:$0xff] %v1108_v43 }
  0x57   :  { %v1100_v39 = vld [vmem:[%s2312_s0 + $0x5a0] sm:$0xff]  ;;  %1099 = vst [vmem:[%s2313_s1 + $0x2b0] sm:$0xff] %v1098_v38  ;;  %1111 = vst [vmem:[%s2313_s1 + $0x208] sm:$0xff] %v1110_v44  ;;  %v1114_v46 = vld [vmem:[%s2312_s0 + $0x2b8] sm:$0xff] }
  0x58   :  { %1101 = vst [vmem:[%s2313_s1 + $0x5b0] sm:$0xff] %v1100_v39  ;;  %1113 = vst [vmem:[%s2313_s1 + $0x508] sm:$0xff] %v1112_v45  ;;  %v1116_v47 = vld [vmem:[%s2312_s0 + $0x5b8] sm:$0xff]  ;;  %v1118_v48 = vld [vmem:[%s2312_s0 + $0x90] sm:$0xff] }
  0x59   :  { %1115 = vst [vmem:[%s2313_s1 + $0x2c8] sm:$0xff] %v1114_v46  ;;  %1117 = vst [vmem:[%s2313_s1 + $0x5c8] sm:$0xff] %v1116_v47  ;;  %v1120_v49 = vld [vmem:[%s2312_s0 + $0x390] sm:$0xff]  ;;  %v1134_v56 = vld [vmem:[%s2312_s0 + $0xa8] sm:$0xff] }
  0x5a   :  { %1119 = vst [vmem:[%s2313_s1 + $0xa0] sm:$0xff] %v1118_v48  ;;  %v1122_v50 = vld [vmem:[%s2312_s0 + $0x150] sm:$0xff]  ;;  %1121 = vst [vmem:[%s2313_s1 + $0x3a0] sm:$0xff] %v1120_v49  ;;  %v1136_v57 = vld [vmem:[%s2312_s0 + $0x3a8] sm:$0xff] }
  0x5b   :  { %v1124_v51 = vld [vmem:[%s2312_s0 + $0x450] sm:$0xff]  ;;  %1123 = vst [vmem:[%s2313_s1 + $0x160] sm:$0xff] %v1122_v50  ;;  %1135 = vst [vmem:[%s2313_s1 + $0xb8] sm:$0xff] %v1134_v56  ;;  %v1138_v58 = vld [vmem:[%s2312_s0 + $0x168] sm:$0xff] }
  0x5c   :  { %1125 = vst [vmem:[%s2313_s1 + $0x460] sm:$0xff] %v1124_v51  ;;  %v1126_v52 = vld [vmem:[%s2312_s0 + $0x210] sm:$0xff]  ;;  %1137 = vst [vmem:[%s2313_s1 + $0x3b8] sm:$0xff] %v1136_v57  ;;  %v1140_v59 = vld [vmem:[%s2312_s0 + $0x468] sm:$0xff] }
  0x5d   :  { %v1128_v53 = vld [vmem:[%s2312_s0 + $0x510] sm:$0xff]  ;;  %1127 = vst [vmem:[%s2313_s1 + $0x220] sm:$0xff] %v1126_v52  ;;  %v1142_v60 = vld [vmem:[%s2312_s0 + $0x228] sm:$0xff]  ;;  %1139 = vst [vmem:[%s2313_s1 + $0x178] sm:$0xff] %v1138_v58 }
  0x5e   :  { %v1130_v54 = vld [vmem:[%s2312_s0 + $0x2d0] sm:$0xff]  ;;  %1129 = vst [vmem:[%s2313_s1 + $0x520] sm:$0xff] %v1128_v53  ;;  %1141 = vst [vmem:[%s2313_s1 + $0x478] sm:$0xff] %v1140_v59  ;;  %v1144_v61 = vld [vmem:[%s2312_s0 + $0x528] sm:$0xff] }
  0x5f   :  { %1131 = vst [vmem:[%s2313_s1 + $0x2e0] sm:$0xff] %v1130_v54  ;;  %v1132_v55 = vld [vmem:[%s2312_s0 + $0x5d0] sm:$0xff]  ;;  %1143 = vst [vmem:[%s2313_s1 + $0x238] sm:$0xff] %v1142_v60  ;;  %v1146_v62 = vld [vmem:[%s2312_s0 + $0x2e8] sm:$0xff] }
  0x60   :  { %1133 = vst [vmem:[%s2313_s1 + $0x5e0] sm:$0xff] %v1132_v55  ;;  %v1148_v63 = vld [vmem:[%s2312_s0 + $0x5e8] sm:$0xff]  ;;  %1145 = vst [vmem:[%s2313_s1 + $0x538] sm:$0xff] %v1144_v61 }
  0x61   :  { %1147 = vst [vmem:[%s2313_s1 + $0x2f8] sm:$0xff] %v1146_v62  ;;  %1149 = vst [vmem:[%s2313_s1 + $0x5f8] sm:$0xff] %v1148_v63 }

</bundles_post_ra>
